<compile_context>
chip_gen: v7x
topology: tpu7x:2x2x1
jax: 0.10.0
libtpu: 0.0.40
codegen_flags: <defaults>
</compile_context>

<pallas_src>
import functools

import jax
import jax.numpy as jnp
from jax.experimental import pallas as pl
from jax.experimental.pallas import tpu as pltpu


# ----------------------------------------------------------------------------
# Fused GraphLearn + Chebyshev kernel (two graphs packed per 128-lane tile)
# ----------------------------------------------------------------------------
def _gcn_block_kernel(a_smem, xt_ref, xbd_ref, theta_ref, gcn_ref, s_ref, *,
                      n_pairs_blk, v_real, f_dim, k_order):
    vp = xt_ref.shape[2] // 2            # padded vertices per graph (sublane mult.)
    w = 2 * vp                           # packed lane width: two graphs side by side

    # ---- loop-invariant masks (built once per grid step, shared by all pairs) ----
    row_i = jax.lax.broadcasted_iota(jnp.int32, (vp, w), 0)
    col_j = jax.lax.broadcasted_iota(jnp.int32, (vp, w), 1)
    col_in_g0 = col_j < vp                                  # which graph owns this lane
    col_local = jnp.where(col_in_g0, col_j, col_j - vp)     # column index within graph
    is_diag = row_i == col_local
    valid = (row_i < v_real) & (col_local < v_real)         # mask zero-padded vertices
    eye = jnp.where(is_diag, 1.0, 0.0).astype(jnp.float32) if k_order > 2 else None

    theta_all = theta_ref[...]                              # (K, 2F, 2H), resident
    a_vals = [a_smem[i] for i in range(f_dim)]              # hoisted SMEM scalar reads

    @pl.loop(0, n_pairs_blk)             # one pair at a time: bounded live ranges
    def _(p):
        xt = xt_ref[p]                   # (F, 2VP)   vertices on lanes, both graphs
        xbd = xbd_ref[p]                 # (2VP, 2F)  block-diagonal pair signal

        # ---------------- GraphLearn ----------------
        # score[i, j] = sum_f a_f * |x[i, f] - x[j, f]|, per graph half, accumulated
        # feature by feature on full 128-lane tiles.
        score = jnp.zeros((vp, w), jnp.float32)
        for f in range(f_dim):
            rj = xt[f:f + 1, :]                               # (1, 2VP) row values
            c0 = xbd[0:vp, f:f + 1]                           # (VP, 1) graph-0 columns
            c1 = xbd[vp:w, f_dim + f:f_dim + f + 1]           # (VP, 1) graph-1 columns
            ci = jnp.where(col_in_g0, c0, c1)                 # (VP, 2VP)
            score = score + a_vals[f] * jnp.abs(ci - rj)
        score = jnp.maximum(score, 0.0)                       # ReLU, as in the module
        tmp = jnp.where(valid, jnp.exp(-score), 0.0)          # zero the padded rows/cols
        colsum = jnp.sum(tmp, axis=0, keepdims=True)          # (1, 2VP): torch dim=1 sum
        s = tmp / jnp.maximum(colsum, 1e-12)                  # exact divide (fidelity)
        s_ref[p] = s                                          # lane-dense (VP, 128) store

        # ---------------- Chebyshev conv (lambda_max ~= 2) ----------------
        d_diag = jnp.sum(s, axis=0, keepdims=True)            # diag(D) = column sums of S
        # l_t = D - S - I, with D and I folded into one select (no extra temporaries).
        l_t = jnp.where(is_diag, d_diag - 1.0, 0.0) - s

        # T_0 @ x for both graphs at once: collapse the block-diagonal signal.
        rhs = xbd[0:vp, :] + xbd[vp:w, :]                     # (VP, 2F)
        out = jnp.dot(rhs, theta_all[0], preferred_element_type=jnp.float32)
        if k_order > 1:
            rhs = jnp.dot(l_t, xbd, preferred_element_type=jnp.float32)
            out = out + jnp.dot(rhs, theta_all[1], preferred_element_type=jnp.float32)
            t_km2, t_km1 = eye, l_t
            for k in range(2, k_order):
                # Elementwise recurrence, exactly as in the PyTorch module.
                t_k = 2.0 * l_t * t_km1 - t_km2
                rhs = jnp.dot(t_k, xbd, preferred_element_type=jnp.float32)
                out = out + jnp.dot(rhs, theta_all[k], preferred_element_type=jnp.float32)
                t_km2, t_km1 = t_km1, t_k
        gcn_ref[p] = jnp.maximum(out, 0.0)                    # (VP, 2H), final ReLU


def _pairs_per_step(n_pairs):
    """Graph pairs per grid step, chosen by TensorCore count per chip."""
    try:
        kind = jax.devices()[0].device_kind.lower()
    except Exception:
        kind = ""
    single_core = ("v5" in kind) or ("v6" in kind)
    if single_core or n_pairs < 2:
        return n_pairs                      # 1 grid step: no per-step overhead
    # Multi-TensorCore chips (e.g. v7x): keep >= 2 parallel grid steps.
    for cand in range(n_pairs // 2, 0, -1):
        if n_pairs % cand == 0:
            return cand
    return 1


@jax.jit
def gcn_block_forward(x, a, thetas):
    """GCNBlock.forward.  x: (N, V, F), a: (F, 1), thetas: (K, F, H).
    Returns (gcn (N, V, H), s (N, V, V), ajloss)."""
    n, v, f = x.shape
    k_order, _, h = thetas.shape
    vp = ((v + 7) // 8) * 8                 # pad vertices 62 -> 64 (sublane multiple)
    n_even = n + (n % 2)                    # graphs are processed in lane-packed pairs
    n_pairs = n_even // 2
    ppstep = _pairs_per_step(n_pairs)

    x32 = x.astype(jnp.float32)
    xp = jnp.pad(x32, ((0, n_even - n), (0, vp - v), (0, 0)))        # (Ne, VP, F)
    x0, x1 = xp[0::2], xp[1::2]                                      # (NP, VP, F) each

    # Row-value slab: both graphs of a pair on the lane axis -> (NP, F, 2*VP).
    xt_pair = jnp.concatenate([jnp.swapaxes(x0, 1, 2),
                               jnp.swapaxes(x1, 1, 2)], axis=2)
    # Block-diagonal pair signal -> (NP, 2*VP, 2*F); one dot serves both graphs.
    zf = jnp.zeros_like(x0)
    x_bd = jnp.concatenate([jnp.concatenate([x0, zf], axis=2),
                            jnp.concatenate([zf, x1], axis=2)], axis=1)
    # Block-diagonal theta -> (K, 2*F, 2*H); produces the packed (VP, 2*H) output.
    th = thetas.astype(jnp.float32)
    zth = jnp.zeros_like(th)
    theta_bd = jnp.concatenate([jnp.concatenate([th, zth], axis=2),
                                jnp.concatenate([zth, th], axis=2)], axis=1)
    a_vec = a.reshape(f).astype(jnp.float32)                         # SMEM scalars

    kernel = functools.partial(_gcn_block_kernel, n_pairs_blk=ppstep, v_real=v,
                               f_dim=f, k_order=k_order)
    gcn_pk, s_pk = pl.pallas_call(
        kernel,
        out_shape=(jax.ShapeDtypeStruct((n_pairs, vp, 2 * h), jnp.float32),
                   jax.ShapeDtypeStruct((n_pairs, vp, 2 * vp), jnp.float32)),
        grid=(n_pairs // ppstep,),
        in_specs=[
            pl.BlockSpec(memory_space=pltpu.MemorySpace.SMEM),           # a (F,)
            pl.BlockSpec((ppstep, f, 2 * vp), lambda i: (i, 0, 0)),      # xt (pairs)
            pl.BlockSpec((ppstep, 2 * vp, 2 * f), lambda i: (i, 0, 0)),  # x block-diag
            pl.BlockSpec((k_order, 2 * f, 2 * h), lambda i: (0, 0, 0)),  # theta blk-diag
        ],
        out_specs=(
            pl.BlockSpec((ppstep, vp, 2 * h), lambda i: (i, 0, 0)),      # gcn (packed)
            pl.BlockSpec((ppstep, vp, 2 * vp), lambda i: (i, 0, 0)),     # S   (packed)
        ),
        compiler_params=pltpu.CompilerParams(dimension_semantics=("parallel",)),
    )(a_vec, xt_pair, x_bd, theta_bd)

    # Unpack the two lane-packed graphs per pair back to the batch axis.
    gcn = gcn_pk.reshape(n_pairs, vp, 2, h).transpose(0, 2, 1, 3)
    gcn = gcn.reshape(n_even, vp, h)[:n, :v, :]
    s = s_pk.reshape(n_pairs, vp, 2, vp).transpose(0, 2, 1, 3)
    s = s.reshape(n_even, vp, vp)[:n, :v, :v]
    # TODO(synk): losses.f_norm_loss / losses.diff_loss are not defined in the
    # provided source, so GraphLearn's ajloss cannot be reproduced; returning 0.
    ajloss = jnp.float32(0.0)
    return gcn, s, ajloss


# ----------------------------------------------------------------------------
# Plain-JAX reference (mirrors the PyTorch module) for an in-script sanity check
# ----------------------------------------------------------------------------
def gcn_block_reference(x, a, thetas):
    n, v, f = x.shape
    k_order, _, h = thetas.shape
    x = x.astype(jnp.float32)
    a_vec = a.reshape(f).astype(jnp.float32)
    diff = jnp.abs(x[:, :, None, :] - x[:, None, :, :])                    # (N,V,V,F)
    score = jnp.einsum('nijf,f->nij', diff, a_vec, precision='highest')
    tmp = jnp.exp(-jnp.maximum(score, 0.0))
    s = tmp / jnp.sum(tmp, axis=1, keepdims=True)
    eye = jnp.eye(v, dtype=jnp.float32)
    d = jnp.sum(s, axis=1)[:, None, :] * eye[None]                         # diag_embed
    l_t = d - s - eye[None]
    polys = [jnp.broadcast_to(eye[None], (n, v, v)), l_t]
    for k in range(2, k_order):
        polys.append(2.0 * l_t * polys[k - 1] - polys[k - 2])
    out = jnp.zeros((n, v, h), jnp.float32)
    for k in range(k_order):
        rhs = jnp.einsum('nuv,nvf->nuf', polys[k], x, precision='highest')
        out = out + jnp.einsum('nuf,fh->nuh', rhs, thetas[k].astype(jnp.float32),
                               precision='highest')
    return jnp.maximum(out, 0.0), s


# ----------------------------------------------------------------------------
if __name__ == "__main__":
    net_params = dict(
        num_of_features=5,          # F  (e.g. 5 frequency bands)
        num_of_vertices=62,         # V  (62 EEG channels)
        node_feature_hidden1=16,    # number of Chebyshev filters (H)
        K=3,                        # Chebyshev order
        GLalpha=0.01,
        DEVICE="tpu",
    )
    key = jax.random.PRNGKey(0)
    k_x, k_t = jax.random.split(key)
    n = 8
    v = net_params['num_of_vertices']
    f = net_params['num_of_features']
    h = net_params['node_feature_hidden1']
    k_order = net_params['K']

    x = jax.random.normal(k_x, (n, v, f), jnp.float32)
    a = jnp.ones((f, 1), jnp.float32)                                   # GraphLearn.a (ones_)
    thetas = jax.random.uniform(k_t, (k_order, f, h), jnp.float32)      # ChebyshevConv.theta

    gcn, s, ajloss = gcn_block_forward(x, a, thetas)
    gcn, s, ajloss = jax.block_until_ready((gcn, s, ajloss))

    assert gcn.shape == (n, v, h)
    assert s.shape == (n, v, v)
    assert bool(jnp.all(jnp.isfinite(gcn))) and bool(jnp.all(jnp.isfinite(s)))

    # Numerical check against the plain-JAX reference of the same forward.
    gcn_ref, s_ref = gcn_block_reference(x, a, thetas)
    g_err = float(jnp.max(jnp.abs(gcn - gcn_ref)) / (jnp.max(jnp.abs(gcn_ref)) + 1e-6))
    s_err = float(jnp.max(jnp.abs(s - s_ref)) / (jnp.max(jnp.abs(s_ref)) + 1e-6))
    assert s_err < 1e-3, s_err
    assert g_err < 2e-2, g_err

    print("KERNEL_OK")
</pallas_src>

<mosaic_0001>
module attributes {stable_mosaic.version = 11 : i64} {
  func.func @_gcn_block_kernel(%arg0: i32, %arg1: memref<5xf32, #tpu.memory_space<smem>>, %arg2: memref<2x5x128xf32, #tpu.memory_space<vmem>>, %arg3: memref<2x128x10xf32, #tpu.memory_space<vmem>>, %arg4: memref<3x10x32xf32, #tpu.memory_space<vmem>>, %arg5: memref<2x64x32xf32, #tpu.memory_space<vmem>>, %arg6: memref<2x64x128xf32, #tpu.memory_space<vmem>>) attributes {dimension_semantics = [#tpu.dimension_semantics<parallel>], iteration_bounds = array<i64: 2>, scalar_prefetch = 0 : i64, scratch_operands = 0 : i64, tpu.core_type = #tpu.core_type<tc>, window_params = [{transform_indices = @transform_0, window_bounds = array<i64: 5>}, {transform_indices = @transform_1, window_bounds = array<i64: 2, 5, 128>}, {transform_indices = @transform_2, window_bounds = array<i64: 2, 128, 10>}, {pipeline_mode = #tpu.pipeline_mode<synchronous>, transform_indices = @transform_3, window_bounds = array<i64: 3, 10, 32>}, {transform_indices = @transform_4, window_bounds = array<i64: 2, 64, 32>}, {transform_indices = @transform_5, window_bounds = array<i64: 2, 64, 128>}]} {
    %0 = tpu.iota {dimensions = array<i32: 0>} : vector<64x128xi32>
    %1 = tpu.iota {dimensions = array<i32: 1>} : vector<64x128xi32>
    %c64_i32 = arith.constant 64 : i32
    %2 = vector.broadcast %c64_i32 : i32 to vector<64x128xi32>
    %3 = arith.cmpi slt, %1, %2 : vector<64x128xi32>
    %c64_i32_0 = arith.constant 64 : i32
    %4 = vector.broadcast %c64_i32_0 : i32 to vector<64x128xi32>
    %5 = arith.subi %1, %4 : vector<64x128xi32>
    %6 = arith.select %3, %1, %5 : vector<64x128xi1>, vector<64x128xi32>
    %7 = arith.cmpi eq, %0, %6 : vector<64x128xi32>
    %c62_i32 = arith.constant 62 : i32
    %8 = vector.broadcast %c62_i32 : i32 to vector<64x128xi32>
    %9 = arith.cmpi slt, %0, %8 : vector<64x128xi32>
    %c62_i32_1 = arith.constant 62 : i32
    %10 = vector.broadcast %c62_i32_1 : i32 to vector<64x128xi32>
    %11 = arith.cmpi slt, %6, %10 : vector<64x128xi32>
    %12 = arith.andi %9, %11 : vector<64x128xi1>
    %cst = arith.constant 1.000000e+00 : f32
    %cst_2 = arith.constant 0.000000e+00 : f32
    %13 = vector.broadcast %cst : f32 to vector<64x128xf32>
    %14 = vector.broadcast %cst_2 : f32 to vector<64x128xf32>
    %15 = arith.select %7, %13, %14 : vector<64x128xi1>, vector<64x128xf32>
    %c0 = arith.constant 0 : index
    %c0_3 = arith.constant 0 : index
    %c0_4 = arith.constant 0 : index
    %16 = vector.load %arg4[%c0, %c0_3, %c0_4] : memref<3x10x32xf32, #tpu.memory_space<vmem>>, vector<3x10x32xf32>
    %c0_5 = arith.constant 0 : index
    %17 = memref.load %arg1[%c0_5] : memref<5xf32, #tpu.memory_space<smem>>
    %c1 = arith.constant 1 : index
    %18 = memref.load %arg1[%c1] : memref<5xf32, #tpu.memory_space<smem>>
    %c2 = arith.constant 2 : index
    %19 = memref.load %arg1[%c2] : memref<5xf32, #tpu.memory_space<smem>>
    %c3 = arith.constant 3 : index
    %20 = memref.load %arg1[%c3] : memref<5xf32, #tpu.memory_space<smem>>
    %c4 = arith.constant 4 : index
    %21 = memref.load %arg1[%c4] : memref<5xf32, #tpu.memory_space<smem>>
    %c0_i32 = arith.constant 0 : i32
    %c2_i32 = arith.constant 2 : i32
    %22 = arith.addi %c0_i32, %c2_i32 : i32
    %c1_i32 = arith.constant 1 : i32
    scf.for %arg7 = %c0_i32 to %22 step %c1_i32  : i32 {
      %c1_i32_7 = arith.constant 1 : i32
      %23 = arith.muli %arg7, %c1_i32_7 : i32
      %c0_i32_8 = arith.constant 0 : i32
      %24 = arith.addi %c0_i32_8, %23 : i32
      %25 = arith.index_cast %24 : i32 to index
      %c0_9 = arith.constant 0 : index
      %c0_10 = arith.constant 0 : index
      %26 = vector.load %arg2[%25, %c0_9, %c0_10] : memref<2x5x128xf32, #tpu.memory_space<vmem>>, vector<1x5x128xf32>
      %27 = vector.shape_cast %26 : vector<1x5x128xf32> to vector<5x128xf32>
      %28 = arith.index_cast %24 : i32 to index
      %c0_11 = arith.constant 0 : index
      %c0_12 = arith.constant 0 : index
      %29 = vector.load %arg3[%28, %c0_11, %c0_12] : memref<2x128x10xf32, #tpu.memory_space<vmem>>, vector<1x128x10xf32>
      %30 = vector.shape_cast %29 : vector<1x128x10xf32> to vector<128x10xf32>
      %cst_13 = arith.constant 0.000000e+00 : f32
      %31 = vector.broadcast %cst_13 : f32 to vector<64x128xf32>
      %32 = vector.extract_strided_slice %27 {offsets = [0, 0], sizes = [1, 128], strides = [1, 1]} : vector<5x128xf32> to vector<1x128xf32>
      %33 = vector.extract_strided_slice %30 {offsets = [0, 0], sizes = [64, 1], strides = [1, 1]} : vector<128x10xf32> to vector<64x1xf32>
      %34 = vector.extract_strided_slice %30 {offsets = [64, 5], sizes = [64, 1], strides = [1, 1]} : vector<128x10xf32> to vector<64x1xf32>
      %35 = vector.shape_cast %33 : vector<64x1xf32> to vector<64x1xf32>
      %36 = vector.broadcast %35 : vector<64x1xf32> to vector<64x128xf32>
      %37 = vector.shape_cast %34 : vector<64x1xf32> to vector<64x1xf32>
      %38 = vector.broadcast %37 : vector<64x1xf32> to vector<64x128xf32>
      %39 = arith.select %3, %36, %38 : vector<64x128xi1>, vector<64x128xf32>
      %40 = vector.broadcast %32 : vector<1x128xf32> to vector<64x128xf32>
      %41 = arith.subf %39, %40 : vector<64x128xf32>
      %42 = math.absf %41 : vector<64x128xf32>
      %43 = vector.broadcast %17 : f32 to vector<64x128xf32>
      %44 = arith.mulf %43, %42 : vector<64x128xf32>
      %45 = arith.addf %31, %44 : vector<64x128xf32>
      %46 = vector.extract_strided_slice %27 {offsets = [1, 0], sizes = [1, 128], strides = [1, 1]} : vector<5x128xf32> to vector<1x128xf32>
      %47 = vector.extract_strided_slice %30 {offsets = [0, 1], sizes = [64, 1], strides = [1, 1]} : vector<128x10xf32> to vector<64x1xf32>
      %48 = vector.extract_strided_slice %30 {offsets = [64, 6], sizes = [64, 1], strides = [1, 1]} : vector<128x10xf32> to vector<64x1xf32>
      %49 = vector.shape_cast %47 : vector<64x1xf32> to vector<64x1xf32>
      %50 = vector.broadcast %49 : vector<64x1xf32> to vector<64x128xf32>
      %51 = vector.shape_cast %48 : vector<64x1xf32> to vector<64x1xf32>
      %52 = vector.broadcast %51 : vector<64x1xf32> to vector<64x128xf32>
      %53 = arith.select %3, %50, %52 : vector<64x128xi1>, vector<64x128xf32>
      %54 = vector.broadcast %46 : vector<1x128xf32> to vector<64x128xf32>
      %55 = arith.subf %53, %54 : vector<64x128xf32>
      %56 = math.absf %55 : vector<64x128xf32>
      %57 = vector.broadcast %18 : f32 to vector<64x128xf32>
      %58 = arith.mulf %57, %56 : vector<64x128xf32>
      %59 = arith.addf %45, %58 : vector<64x128xf32>
      %60 = vector.extract_strided_slice %27 {offsets = [2, 0], sizes = [1, 128], strides = [1, 1]} : vector<5x128xf32> to vector<1x128xf32>
      %61 = vector.extract_strided_slice %30 {offsets = [0, 2], sizes = [64, 1], strides = [1, 1]} : vector<128x10xf32> to vector<64x1xf32>
      %62 = vector.extract_strided_slice %30 {offsets = [64, 7], sizes = [64, 1], strides = [1, 1]} : vector<128x10xf32> to vector<64x1xf32>
      %63 = vector.shape_cast %61 : vector<64x1xf32> to vector<64x1xf32>
      %64 = vector.broadcast %63 : vector<64x1xf32> to vector<64x128xf32>
      %65 = vector.shape_cast %62 : vector<64x1xf32> to vector<64x1xf32>
      %66 = vector.broadcast %65 : vector<64x1xf32> to vector<64x128xf32>
      %67 = arith.select %3, %64, %66 : vector<64x128xi1>, vector<64x128xf32>
      %68 = vector.broadcast %60 : vector<1x128xf32> to vector<64x128xf32>
      %69 = arith.subf %67, %68 : vector<64x128xf32>
      %70 = math.absf %69 : vector<64x128xf32>
      %71 = vector.broadcast %19 : f32 to vector<64x128xf32>
      %72 = arith.mulf %71, %70 : vector<64x128xf32>
      %73 = arith.addf %59, %72 : vector<64x128xf32>
      %74 = vector.extract_strided_slice %27 {offsets = [3, 0], sizes = [1, 128], strides = [1, 1]} : vector<5x128xf32> to vector<1x128xf32>
      %75 = vector.extract_strided_slice %30 {offsets = [0, 3], sizes = [64, 1], strides = [1, 1]} : vector<128x10xf32> to vector<64x1xf32>
      %76 = vector.extract_strided_slice %30 {offsets = [64, 8], sizes = [64, 1], strides = [1, 1]} : vector<128x10xf32> to vector<64x1xf32>
      %77 = vector.shape_cast %75 : vector<64x1xf32> to vector<64x1xf32>
      %78 = vector.broadcast %77 : vector<64x1xf32> to vector<64x128xf32>
      %79 = vector.shape_cast %76 : vector<64x1xf32> to vector<64x1xf32>
      %80 = vector.broadcast %79 : vector<64x1xf32> to vector<64x128xf32>
      %81 = arith.select %3, %78, %80 : vector<64x128xi1>, vector<64x128xf32>
      %82 = vector.broadcast %74 : vector<1x128xf32> to vector<64x128xf32>
      %83 = arith.subf %81, %82 : vector<64x128xf32>
      %84 = math.absf %83 : vector<64x128xf32>
      %85 = vector.broadcast %20 : f32 to vector<64x128xf32>
      %86 = arith.mulf %85, %84 : vector<64x128xf32>
      %87 = arith.addf %73, %86 : vector<64x128xf32>
      %88 = vector.extract_strided_slice %27 {offsets = [4, 0], sizes = [1, 128], strides = [1, 1]} : vector<5x128xf32> to vector<1x128xf32>
      %89 = vector.extract_strided_slice %30 {offsets = [0, 4], sizes = [64, 1], strides = [1, 1]} : vector<128x10xf32> to vector<64x1xf32>
      %90 = vector.extract_strided_slice %30 {offsets = [64, 9], sizes = [64, 1], strides = [1, 1]} : vector<128x10xf32> to vector<64x1xf32>
      %91 = vector.shape_cast %89 : vector<64x1xf32> to vector<64x1xf32>
      %92 = vector.broadcast %91 : vector<64x1xf32> to vector<64x128xf32>
      %93 = vector.shape_cast %90 : vector<64x1xf32> to vector<64x1xf32>
      %94 = vector.broadcast %93 : vector<64x1xf32> to vector<64x128xf32>
      %95 = arith.select %3, %92, %94 : vector<64x128xi1>, vector<64x128xf32>
      %96 = vector.broadcast %88 : vector<1x128xf32> to vector<64x128xf32>
      %97 = arith.subf %95, %96 : vector<64x128xf32>
      %98 = math.absf %97 : vector<64x128xf32>
      %99 = vector.broadcast %21 : f32 to vector<64x128xf32>
      %100 = arith.mulf %99, %98 : vector<64x128xf32>
      %101 = arith.addf %87, %100 : vector<64x128xf32>
      %cst_14 = arith.constant 0.000000e+00 : f32
      %102 = vector.broadcast %cst_14 : f32 to vector<64x128xf32>
      %103 = arith.maximumf %101, %102 : vector<64x128xf32>
      %cst_15 = arith.constant 0.000000e+00 : f32
      %104 = vector.broadcast %cst_15 : f32 to vector<64x128xf32>
      %105 = arith.subf %104, %103 : vector<64x128xf32>
      %106 = math.exp %105 : vector<64x128xf32>
      %cst_16 = arith.constant 0.000000e+00 : f32
      %107 = vector.broadcast %cst_16 : f32 to vector<64x128xf32>
      %108 = arith.select %12, %106, %107 : vector<64x128xi1>, vector<64x128xf32>
      %cst_17 = arith.constant dense<0.000000e+00> : vector<128xf32>
      %109 = vector.multi_reduction <add>, %108, %cst_17 [0] : vector<64x128xf32> to vector<128xf32>
      %110 = vector.shape_cast %109 : vector<128xf32> to vector<1x128xf32>
      %cst_18 = arith.constant 9.99999996E-13 : f32
      %111 = vector.broadcast %cst_18 : f32 to vector<1x128xf32>
      %112 = arith.maximumf %110, %111 : vector<1x128xf32>
      %113 = vector.broadcast %112 : vector<1x128xf32> to vector<64x128xf32>
      %114 = arith.divf %108, %113 : vector<64x128xf32>
      %115 = arith.index_cast %24 : i32 to index
      %c0_19 = arith.constant 0 : index
      %c0_20 = arith.constant 0 : index
      %116 = vector.load %arg6[%115, %c0_19, %c0_20] : memref<2x64x128xf32, #tpu.memory_space<vmem>>, vector<1x64x128xf32>
      %117 = vector.shape_cast %116 : vector<1x64x128xf32> to vector<64x128xf32>
      %118 = vector.shape_cast %114 : vector<64x128xf32> to vector<1x64x128xf32>
      tpu.vector_store %arg6[%115, %c0_19, %c0_20], %118 {strides = array<i32>} : memref<2x64x128xf32, #tpu.memory_space<vmem>>, vector<1x64x128xf32>,
      %cst_21 = arith.constant dense<0.000000e+00> : vector<128xf32>
      %119 = vector.multi_reduction <add>, %114, %cst_21 [0] : vector<64x128xf32> to vector<128xf32>
      %120 = vector.shape_cast %119 : vector<128xf32> to vector<1x128xf32>
      %cst_22 = arith.constant 1.000000e+00 : f32
      %121 = vector.broadcast %cst_22 : f32 to vector<1x128xf32>
      %122 = arith.subf %120, %121 : vector<1x128xf32>
      %cst_23 = arith.constant 0.000000e+00 : f32
      %123 = vector.shape_cast %122 : vector<1x128xf32> to vector<1x128xf32>
      %124 = vector.broadcast %123 : vector<1x128xf32> to vector<64x128xf32>
      %125 = vector.broadcast %cst_23 : f32 to vector<64x128xf32>
      %126 = arith.select %7, %124, %125 : vector<64x128xi1>, vector<64x128xf32>
      %127 = arith.subf %126, %114 : vector<64x128xf32>
      %128 = vector.extract_strided_slice %30 {offsets = [0, 0], sizes = [64, 10], strides = [1, 1]} : vector<128x10xf32> to vector<64x10xf32>
      %129 = vector.extract_strided_slice %30 {offsets = [64, 0], sizes = [64, 10], strides = [1, 1]} : vector<128x10xf32> to vector<64x10xf32>
      %130 = arith.addf %128, %129 : vector<64x10xf32>
      %131 = vector.extract_strided_slice %16 {offsets = [0, 0, 0], sizes = [1, 10, 32], strides = [1, 1, 1]} : vector<3x10x32xf32> to vector<1x10x32xf32>
      %132 = vector.shape_cast %131 : vector<1x10x32xf32> to vector<10x32xf32>
      %cst_24 = arith.constant dense<0.000000e+00> : vector<64x32xf32>
      %133 = tpu.matmul %130, %132, %cst_24 {dimension_numbers = #tpu.dot_dimension_numbers<[1], [0], [0], [1], [0, 0, 1, 1], [], []>} : vector<64x10xf32>, vector<10x32xf32>, vector<64x32xf32> -> vector<64x32xf32>
      %cst_25 = arith.constant dense<0.000000e+00> : vector<64x10xf32>
      %134 = tpu.matmul %127, %30, %cst_25 {dimension_numbers = #tpu.dot_dimension_numbers<[1], [0], [0], [1], [0, 0, 1, 1], [], []>} : vector<64x128xf32>, vector<128x10xf32>, vector<64x10xf32> -> vector<64x10xf32>
      %135 = vector.extract_strided_slice %16 {offsets = [1, 0, 0], sizes = [1, 10, 32], strides = [1, 1, 1]} : vector<3x10x32xf32> to vector<1x10x32xf32>
      %136 = vector.shape_cast %135 : vector<1x10x32xf32> to vector<10x32xf32>
      %cst_26 = arith.constant dense<0.000000e+00> : vector<64x32xf32>
      %137 = tpu.matmul %134, %136, %cst_26 {dimension_numbers = #tpu.dot_dimension_numbers<[1], [0], [0], [1], [0, 0, 1, 1], [], []>} : vector<64x10xf32>, vector<10x32xf32>, vector<64x32xf32> -> vector<64x32xf32>
      %138 = arith.addf %133, %137 : vector<64x32xf32>
      %cst_27 = arith.constant 2.000000e+00 : f32
      %139 = vector.broadcast %cst_27 : f32 to vector<64x128xf32>
      %140 = arith.mulf %139, %127 : vector<64x128xf32>
      %141 = arith.mulf %140, %127 : vector<64x128xf32>
      %142 = arith.subf %141, %15 : vector<64x128xf32>
      %cst_28 = arith.constant dense<0.000000e+00> : vector<64x10xf32>
      %143 = tpu.matmul %142, %30, %cst_28 {dimension_numbers = #tpu.dot_dimension_numbers<[1], [0], [0], [1], [0, 0, 1, 1], [], []>} : vector<64x128xf32>, vector<128x10xf32>, vector<64x10xf32> -> vector<64x10xf32>
      %144 = vector.extract_strided_slice %16 {offsets = [2, 0, 0], sizes = [1, 10, 32], strides = [1, 1, 1]} : vector<3x10x32xf32> to vector<1x10x32xf32>
      %145 = vector.shape_cast %144 : vector<1x10x32xf32> to vector<10x32xf32>
      %cst_29 = arith.constant dense<0.000000e+00> : vector<64x32xf32>
      %146 = tpu.matmul %143, %145, %cst_29 {dimension_numbers = #tpu.dot_dimension_numbers<[1], [0], [0], [1], [0, 0, 1, 1], [], []>} : vector<64x10xf32>, vector<10x32xf32>, vector<64x32xf32> -> vector<64x32xf32>
      %147 = arith.addf %138, %146 : vector<64x32xf32>
      %cst_30 = arith.constant 0.000000e+00 : f32
      %148 = vector.broadcast %cst_30 : f32 to vector<64x32xf32>
      %149 = arith.maximumf %147, %148 : vector<64x32xf32>
      %150 = arith.index_cast %24 : i32 to index
      %c0_31 = arith.constant 0 : index
      %c0_32 = arith.constant 0 : index
      %151 = vector.load %arg5[%150, %c0_31, %c0_32] : memref<2x64x32xf32, #tpu.memory_space<vmem>>, vector<1x64x32xf32>
      %152 = vector.shape_cast %151 : vector<1x64x32xf32> to vector<64x32xf32>
      %153 = vector.shape_cast %149 : vector<64x32xf32> to vector<1x64x32xf32>
      tpu.vector_store %arg5[%150, %c0_31, %c0_32], %153 {strides = array<i32>} : memref<2x64x32xf32, #tpu.memory_space<vmem>>, vector<1x64x32xf32>,
    }
    %c2_i32_6 = arith.constant 2 : i32
    return
  }
  func.func @transform_0(%arg0: i32) -> i32 {
    %c0_i32 = arith.constant 0 : i32
    %c0_i32_0 = arith.constant 0 : i32
    return %c0_i32 : i32
  }
  func.func @transform_1(%arg0: i32) -> (i32, i32, i32) {
    %c0_i32 = arith.constant 0 : i32
    %c0_i32_0 = arith.constant 0 : i32
    %c0_i32_1 = arith.constant 0 : i32
    return %arg0, %c0_i32, %c0_i32_0 : i32, i32, i32
  }
  func.func @transform_2(%arg0: i32) -> (i32, i32, i32) {
    %c0_i32 = arith.constant 0 : i32
    %c0_i32_0 = arith.constant 0 : i32
    %c0_i32_1 = arith.constant 0 : i32
    return %arg0, %c0_i32, %c0_i32_0 : i32, i32, i32
  }
  func.func @transform_3(%arg0: i32) -> (i32, i32, i32) {
    %c0_i32 = arith.constant 0 : i32
    %c0_i32_0 = arith.constant 0 : i32
    %c0_i32_1 = arith.constant 0 : i32
    %c0_i32_2 = arith.constant 0 : i32
    return %c0_i32, %c0_i32_0, %c0_i32_1 : i32, i32, i32
  }
  func.func @transform_4(%arg0: i32) -> (i32, i32, i32) {
    %c0_i32 = arith.constant 0 : i32
    %c0_i32_0 = arith.constant 0 : i32
    %c0_i32_1 = arith.constant 0 : i32
    return %arg0, %c0_i32, %c0_i32_0 : i32, i32, i32
  }
  func.func @transform_5(%arg0: i32) -> (i32, i32, i32) {
    %c0_i32 = arith.constant 0 : i32
    %c0_i32_0 = arith.constant 0 : i32
    %c0_i32_1 = arith.constant 0 : i32
    return %arg0, %c0_i32, %c0_i32_0 : i32, i32, i32
  }
}

</mosaic_0001>

<bundles_post_ra>
// kernel: gcn_block_forward.1
= control target key start
LH: loop header
LB: loop body
LE: loop exit
PB: predicated region body
PF: predicated region fallthrough
CT: control target
= control target key end

     0   :  { %11 = vsyncpa [#allocation3], 0  ;;  %s2397_s18 = smov 0   ;;  %s3255_s0 = inlined_call_operand.vmem [shape: f32[5], index: 0, kind: input, shape index: {}]   ;;  %s3256_s1 = inlined_call_operand.vmem [shape: f32[4,5,128], index: 1, kind: input, shape index: {}]   ;;  %s3257_s2 = inlined_call_operand.vmem [shape: f32[4,128,10], index: 2, kind: input, shape index: {}]   ;;  %s3258_s3 = inlined_call_operand.vmem [shape: f32[3,10,32], index: 3, kind: input, shape index: {}]   ;;  %s3259_s4 = inlined_call_operand.vmem [shape: f32[4,64,32], index: 4, kind: output, shape index: {0}]   ;;  %s3260_s5 = inlined_call_operand.vmem [shape: f32[4,64,128], index: 5, kind: output, shape index: {1}]  }
   0x1 LB: > { %s1831_s19 = sadd.s32 4294967295, %s2348_s18   ;;  %p1833_p0 = scmp.ge.s32.totalorder %s2348_s18, 1  ;;  %s2348_s18 = sphi %s2397_s18, %s17_s18  }
   0x2   : > { %p168_p1 = scmp.lt.s32.totalorder %s2348_s18, 3  ;;  %s181_s22 = sshll.u32 %s3255_s0, 4  ;;  %s182_s22 = int_to_ptr.vmem [resolvable:$true] %s181_s22 }
   0x3   : > { %p2412_p3 = scmp.eq.s32.totalorder %s1831_s19, 0  ;;  %s2319_s25 = scalar_lea.vmem %s182_s22, 16 }
   0x4   : > { %p2408_p2 = pnand %p1833_p0, %p168_p1  ;;  %p2320_p6 = scmp.ne.s32.totalorder %s182_s22, %s2319_s25 }
   0x5   : > { %p2327_p10 = scmp.lt.s32.totalorder %s182_s22, %s182_s22  ;;  %p2328_p11 = scmp.lt.s32.totalorder %s2319_s25, %s2319_s25 }
   0x6   : > { %p2206_p4 = pneg %p2408_p2 }
   0x7   : > { %p2329_p12 = por %p2328_p11, %p2327_p10 }
   0x8   : > { %p2207_p5 = pnand %p2412_p3, %p2206_p4 }
   0xa   : > { %p2321_p7 = pneg %p2207_p5 }
   0xc   : > { %p2322_p8 = pnand %p2321_p7, %p2320_p6 }
   0xe   : > { %p2323_p9 = pneg %p2322_p8 }
  0x10   : > { %p2330_p13 = pnand %p2329_p12, %p2323_p9 }
  0x12   : > { %2333 = shalt.err (!%p2330_p13)
}
  0x13   : > { %s2354_s26 = smov [#allocation2]   ;;  %216 = sbr.rel (%p2408_p2) target bundleno = 968 (0x3c8), region = 36 }
  0x14   : > { %2209 = dma.vmem_to_smem (!%p2207_p5), %s182_s22, 16, %s2354_s26, [#allocation3]  }
  0x1a   : > { %2343 = dma.done.wait (%p2412_p3), [#allocation3], 16  }
  0x1b   : > { %2345 = vsyncadd (%p2412_p3), [#allocation3], 4294967280 }
  0x1c   : > { %222 = sfence }
  0x1d   : > { %s1838_s27 = sshll.u32 %s1831_s19, 1  ;;  %v285_v0 = vlaneseq  ;;  %v2429_v1 = vld [vmem:[%s3258_s3] sm:$0xff]  ;;  %v2434_v2 = vld [vmem:[%s3258_s3 + $0x8] sm:$0x3]  ;;  %v2439_v3 = vld [vmem:[%s3258_s3 + $0x10] sm:$0xff]  ;;  %s2460_s15 = sld [smem:[#allocation2]] }
  0x1e   : > { %p259_p0 = scmp.lt.s32.totalorder %s1838_s27, 3  ;;  %v2444_v4 = vld [vmem:[%s3258_s3 + $0x18] sm:$0x3]  ;;  %v2449_v5 = vld [vmem:[%s3258_s3 + $0x20] sm:$0xff]  ;;  %v2454_v6 = vld [vmem:[%s3258_s3 + $0x28] sm:$0x3] }
  0x1f   : > { %3286 = vst [vmem:[#allocation5_spill] sm:$0xff] %v2449_v5  ;;  %3287 = vst [vmem:[#allocation6_spill] sm:$0xff] %v2454_v6  ;;  %v2456_v7 = vshrl.u32 %v285_v0, 7  ;;  %v2458_v8 = vand.u32 127, %v285_v0  ;;  %s2462_s16 = sld [smem:[#allocation2 + $0x1]]  ;;  %s2467_s17 = sld [smem:[#allocation2 + $0x2]] }
  0x20   : > { %s3338_s27 = smov (!%p259_p0, %s1838_s27), 3  ;;  %s2499_s29 = sld [smem:[#allocation2 + $0x3]]  ;;  %v2355_v18 = vmov 0.0   ;;  %v3298_v22 = vmov 0 }
  0x21   : > { %v2465_v9 = vadd.s32 8, %v2456_v7  ;;  %s1839_s19 = sshll.u32 %s3338_s27, 3  ;;  %s1887_s20 = sshll.u32 %s3338_s27, 7  ;;  %v2470_v10 = vadd.s32 16, %v2456_v7  ;;  %v2473_v11 = vadd.s32 24, %v2456_v7  ;;  %v2476_v12 = vadd.s32 56, %v2456_v7 }
  0x22   : > { %vm296_vm0 = vcmp.lt.s32.totalorder %v2458_v8, 64  ;;  %s2482_s23 = scalar_lea.vmem %s3256_s1, %s1839_s19  ;;  %s2487_s26 = scalar_lea.vmem %s3257_s2, %s1887_s20  ;;  %v2490_v13 = vadd.s32 32, %v2456_v7  ;;  %v2493_v14 = vadd.s32 40, %v2456_v7  ;;  %v2496_v15 = vadd.s32 48, %v2456_v7 }
  0x23   : > { %3288 = vst [vmem:[#allocation7_spill] sm:$0xff] %v2465_v9  ;;  %3289 = vst [vmem:[#allocation8_spill] sm:$0xff] %v2470_v10  ;;  %v1849_v16 = vadd.s32 4294967232, %v2458_v8  ;;  %s1888_s28 = sshll.u32 %s3338_s27, 6  ;;  %vm314_vm1 = vcmp.lt.s32.totalorder %v2476_v12, 62  ;;  %s2525_s27 = sld [smem:[#allocation2 + $0x4]] }
  0x24   : > { %3290 = vst [vmem:[#allocation9_spill] sm:$0xff] %v2473_v11  ;;  %3291 = vst [vmem:[#allocation10_spill] sm:$0xff] %v2476_v12  ;;  %s2504_s7 = scalar_lea.vmem %s3259_s4, %s1888_s28  ;;  %s2509_s10 = scalar_lea.vmem %s3260_s5, %s1888_s28 }
  0x25   : > { %3292 = vst [vmem:[#allocation11_spill] sm:$0xff] %v2490_v13  ;;  %3293 = vst [vmem:[#allocation12_spill] sm:$0xff] %v2493_v14  ;;  %v2514_v17 = vsel %vm296_vm0, %v2458_v8, %v1849_v16  ;;  %s2584_s11 = smov 0  }
  0x26   : > { %3294 = vst [vmem:[#allocation13_spill] sm:$0xff] %v2496_v15  ;;  %vm299_vm2 = vcmp.eq.s32.totalorder %v2456_v7, %v2514_v17  ;;  %vm300_vm3 = vcmp.eq.s32.totalorder %v2465_v9, %v2514_v17  ;;  %vm301_vm4 = vcmp.eq.s32.totalorder %v2470_v10, %v2514_v17  ;;  %vm302_vm5 = vcmp.eq.s32.totalorder %v2473_v11, %v2514_v17 }
  0x27   : > { %vm303_vm6 = vcmp.eq.s32.totalorder %v2490_v13, %v2514_v17  ;;  %vm304_vm7 = vcmp.eq.s32.totalorder %v2493_v14, %v2514_v17  ;;  %vm305_vm8 = vcmp.eq.s32.totalorder %v2496_v15, %v2514_v17  ;;  %vm306_vm9 = vcmp.eq.s32.totalorder %v2476_v12, %v2514_v17 }
  0x28   : > { %vm315_vm10 = vcmp.lt.s32.totalorder %v2514_v17, 62  ;;  %v2539_v19 = vsel %vm299_vm2, 1.0, %v2355_v18  ;;  %v2544_v20 = vsel %vm300_vm3, 1.0, %v2355_v18  ;;  %v2549_v21 = vsel %vm301_vm4, 1.0, %v2355_v18 }
  0x29   : > { %3295 = vst [vmem:[#allocation14_spill] sm:$0xff] %v2539_v19  ;;  %3296 = vst [vmem:[#allocation15_spill] sm:$0xff] %v2544_v20  ;;  %v2562_v23 = vsel %vm302_vm5, 1.0, %v2355_v18  ;;  %v2567_v24 = vsel %vm303_vm6, 1.0, %v2355_v18  ;;  %v2572_v25 = vsel %vm304_vm7, 1.0, %v2355_v18  ;;  %v2577_v26 = vsel %vm305_vm8, 1.0, %v2355_v18 }
  0x2a   : > { %3297 = vst [vmem:[#allocation16_spill] sm:$0xff] %v2549_v21  ;;  %vm2555_vm11 = vmand %vm314_vm1, %vm315_vm10  ;;  %v2582_v27 = vsel %vm306_vm9, 1.0, %v2355_v18 }
  0x2b   : > { %v3299_v22 = vsel %vm2555_vm11, 4294967295, %v3298_v22  ;;  %3301 = vst [vmem:[#allocation18_spill] sm:$0xff] %v2562_v23  ;;  %3302 = vst [vmem:[#allocation19_spill] sm:$0xff] %v2567_v24 }
  0x2c   : > { %3300 = vst [vmem:[#allocation17_spill] sm:$0xff] %v3299_v22  ;;  %3303 = vst [vmem:[#allocation20_spill] sm:$0xff] %v2572_v25 }
  0x2d   : > { %3304 = vst [vmem:[#allocation21_spill] sm:$0xff] %v2577_v26  ;;  %3305 = vst [vmem:[#allocation22_spill] sm:$0xff] %v2582_v27 }
  0x2e LB: >> { %v3275_v28 = vmov 1   ;;  %v3265_v29 = vmov 5   ;;  %s1855_s12 = sshll.u32 %s2352_s11, 7  ;;  %v3274_v37 = vmov 6   ;;  %v3272_v39 = vmov 7   ;;  %s1854_s14 = sshll.u32 %s2352_s11, 3  ;;  %s2352_s11 = sphi %s2584_s11, %s348_s11  }
  0x2f   : >> { %2242 = vset.pattern.permute.xlu0 %v3275_v28  ;;  %2241 = vset.pattern.permute.xlu1 %v3265_v29  ;;  %s2593_s13 = scalar_lea.vmem %s2487_s26, %s1855_s12  ;;  %v2360_v40 = vmov 0   ;;  %v3261_v44 = vmov 2   ;;  %v3263_v45 = vmov 8   ;;  %v3270_v48 = vmov 3   ;;  %s350_s19 = scalar_lea.vmem %s2482_s23, %s1854_s14 }
  0x30   : >> { %v2596_v30 = vld [vmem:[%s2593_s13 + $0x40] sm:$0xff]  ;;  %v2604_v32 = vld [vmem:[%s2593_s13 + $0x48] sm:$0xff]  ;;  %v2607_v33 = vld [vmem:[%s2593_s13 + $0x10] sm:$0xff]  ;;  %v3268_v51 = vmov 4   ;;  %v3266_v52 = vmov 9   ;;  %v460_v16 = vsub.s32 0, %v2456_v7  ;;  %v2783_v26 = vstv %s2462_s16 }
  0x31   : >> { %v2599_v31 = vld [vmem:[%s2593_s13] sm:$0xff]  ;;  %412 = vperm.xlu1 %2241, %v2596_v30   ;;  %v2615_v35 = vld [vmem:[%s2593_s13 + $0x8] sm:$0xff]  ;;  %v2627_v38 = vld [vmem:[%s2593_s13 + $0x58] sm:$0xff]  ;;  %v3306_v24 = vmov 6   ;;  %v678_v23 = vsub.s32 2, %v2456_v7  ;;  %v3310_v10 = vmov 9  }
  0x32   : >> { %496 = vperm.xlu0 %2242, %v2599_v31   ;;  %v2612_v34 = vld [vmem:[%s2593_s13 + $0x20] sm:$0xff]  ;;  %v2621_v36 = vld [vmem:[%s2593_s13 + $0x28] sm:$0xff]  ;;  %v2638_v42 = vld [vmem:[%s2593_s13 + $0x50] sm:$0xff]  ;;  %vm1172_vm12 = vcmask 1041408   ;;  %vm2366_vm13 = vmmov 1   ;;  %vm1147_vm15 = vcmask 80896  }
  0x33   : >> { %v2633_v41 = vld [vmem:[%s2593_s13 + $0x60] sm:$0xff]  ;;  %v2642_v43 = vld [vmem:[%s2593_s13 + $0x70] sm:$0xff]  ;;  %v2665_v46 = vld [vmem:[%s2593_s13 + $0x18] sm:$0xff]  ;;  %s1856_s20 = sshll.u32 %s2352_s11, 6  ;;  %vm1691_vm1 = vcmask 261120   ;;  %s348_s11 = sadd.s32 1, %s2352_s11  }
  0x34   : >> { %v2674_v47 = vld [vmem:[%s2593_s13 + $0x38] sm:$0xff]  ;;  %v2698_v50 = vld [vmem:[%s2593_s13 + $0x30] sm:$0xff]  ;;  %v2720_v53 = vld [vmem:[%s2593_s13 + $0x68] sm:$0xff]  ;;  %s995_s21 = scalar_lea.vmem %s2509_s10, %s1856_s20  ;;  %s3231_s22 = scalar_lea.vmem %s2504_s7, %s1856_s20 }
  0x35   : >> { %417 = vperm.xlu1 %2241, %v2604_v32   ;;  %v2685_v49 = vld [vmem:[%s2593_s13 + $0x78] sm:$0xff]  ;;  %vm2995_vm14 = vmpackc.low %vm1172_vm12, %vm2366_vm13  ;;  %p345_p1 = scmp.ge.s32.totalorder %s348_s11, 2  }
  0x36   : >> { %504 = vperm.xlu0 %2242, %v2607_v33  }
  0x39   : >> { %2243 = vset.pattern.permute.xlu1 %v3275_v28 }
  0x3a   : >> { %512 = vperm.xlu0 %2242, %v2612_v34   ;;  %500 = vperm.xlu1 %2243, %v2615_v35  }
  0x3e   : >> { %516 = vperm.xlu0 %2242, %v2621_v36   ;;  %2244 = vset.pattern.permute.xlu1 %v3274_v37 }
  0x3f   : >> { %528 = vperm.xlu1 %2244, %v2596_v30  }
  0x42   : >> { %2266 = vset.pattern.permute.xlu0 %v3272_v39 }
  0x43   : >> { %649 = vperm.xlu0 %2266, %v2627_v38   ;;  %2245 = vset.pattern.permute.xlu1 %v2360_v40 }
  0x44   : >> { %382 = vperm.xlu1 %2245, %v2607_v33  }
  0x47   : >> { %653 = vperm.xlu0 %2266, %v2633_v41  }
  0x48   : >> { %2246 = vset.pattern.permute.xlu1 %v3265_v29 }
  0x49   : >> { %422 = vperm.xlu1 %2246, %v2638_v42  }
  0x4b   : >> { %2273 = vset.pattern.permute.xlu0 %v3265_v29 }
  0x4c   : >> { %442 = vperm.xlu0 %2273, %v2642_v43  }
  0x4d   : >> { %2247 = vset.pattern.permute.xlu1 %v3274_v37 }
  0x4e   : >> { %536 = vperm.xlu1 %2247, %v2638_v42  }
  0x50   : >> { %2274 = vset.pattern.permute.xlu0 %v3261_v44 }
  0x51   : >> { %609 = vperm.xlu0 %2274, %v2615_v35  }
  0x52   : >> { %2248 = vset.pattern.permute.xlu1 %v3261_v44 }
  0x53   : >> { %605 = vperm.xlu1 %2248, %v2599_v31  }
  0x55   : >> { %625 = vperm.xlu0 %2274, %v2621_v36  }
  0x57   : >> { %2249 = vset.pattern.permute.xlu1 %v3272_v39 }
  0x58   : >> { %637 = vperm.xlu1 %2249, %v2596_v30  }
  0x59   : >> { %2277 = vset.pattern.permute.xlu0 %v3263_v45 }
  0x5a   : >> { %750 = vperm.xlu0 %2277, %v2604_v32  }
  0x5c   : >> { %641 = vperm.xlu1 %2249, %v2604_v32  }
  0x5e   : >> { %762 = vperm.xlu0 %2277, %v2633_v41  }
  0x60   : >> { %2250 = vset.pattern.permute.xlu1 %v3265_v29 }
  0x61   : >> { %427 = vperm.xlu1 %2250, %v2627_v38  }
  0x62   : >> { %2280 = vset.pattern.permute.xlu0 %v2360_v40 }
  0x63   : >> { %372 = vperm.xlu0 %2280, %v2599_v31  }
  0x65   : >> { %2251 = vset.pattern.permute.xlu1 %v3275_v28 }
  0x66   : >> { %508 = vperm.xlu1 %2251, %v2665_v46  }
  0x67   : >> { %377 = vperm.xlu0 %2280, %v2615_v35  }
  0x6a   : >> { %2252 = vset.pattern.permute.xlu1 %v3261_v44 }
  0x6b   : >> { %387 = vperm.xlu0 %2280, %v2665_v46   ;;  %613 = vperm.xlu1 %2252, %v2607_v33  }
  0x6f   : >> { %407 = vperm.xlu0 %2280, %v2674_v47   ;;  %2253 = vset.pattern.permute.xlu1 %v3272_v39 }
  0x70   : >> { %645 = vperm.xlu1 %2253, %v2638_v42  }
  0x73   : >> { %2283 = vset.pattern.permute.xlu0 %v3274_v37 }
  0x74   : >> { %532 = vperm.xlu0 %2283, %v2604_v32   ;;  %2254 = vset.pattern.permute.xlu1 %v3270_v48 }
  0x75   : >> { %718 = vperm.xlu1 %2254, %v2615_v35  }
  0x78   : >> { %540 = vperm.xlu0 %2283, %v2627_v38  }
  0x79   : >> { %2255 = vset.pattern.permute.xlu1 %v3263_v45 }
  0x7a   : >> { %746 = vperm.xlu1 %2255, %v2596_v30  }
  0x7c   : >> { %556 = vperm.xlu0 %2283, %v2685_v49  }
  0x7e   : >> { %2256 = vset.pattern.permute.xlu1 %v2360_v40 }
  0x7f   : >> { %392 = vperm.xlu1 %2256, %v2612_v34  }
  0x80   : >> { %2286 = vset.pattern.permute.xlu0 %v3270_v48 }
  0x81   : >> { %714 = vperm.xlu0 %2286, %v2599_v31  }
  0x83   : >> { %2257 = vset.pattern.permute.xlu1 %v3265_v29 }
  0x84   : >> { %432 = vperm.xlu1 %2257, %v2633_v41  }
  0x85   : >> { %734 = vperm.xlu0 %2286, %v2621_v36  }
  0x88   : >> { %2258 = vset.pattern.permute.xlu1 %v3274_v37 }
  0x89   : >> { %738 = vperm.xlu0 %2286, %v2698_v50   ;;  %544 = vperm.xlu1 %2258, %v2633_v41  }
  0x8d   : >> { %2293 = vset.pattern.permute.xlu0 %v3268_v51  ;;  %2259 = vset.pattern.permute.xlu1 %v3261_v44 }
  0x8e   : >> { %823 = vperm.xlu0 %2293, %v2599_v31   ;;  %617 = vperm.xlu1 %2259, %v2665_v46  }
  0x92   : >> { %831 = vperm.xlu0 %2293, %v2607_v33   ;;  %2260 = vset.pattern.permute.xlu1 %v3270_v48 }
  0x93   : >> { %722 = vperm.xlu1 %2260, %v2607_v33  }
  0x96   : >> { %847 = vperm.xlu0 %2293, %v2698_v50  }
  0x97   : >> { %2261 = vset.pattern.permute.xlu1 %v3263_v45 }
  0x98   : >> { %754 = vperm.xlu1 %2261, %v2638_v42  }
  0x9a   : >> { %2298 = vset.pattern.permute.xlu0 %v3266_v52 }
  0x9b   : >> { %859 = vperm.xlu0 %2298, %v2604_v32  }
  0x9c   : >> { %2262 = vset.pattern.permute.xlu1 %v3268_v51 }
  0x9d   : >> { %827 = vperm.xlu1 %2262, %v2615_v35  }
  0x9f   : >> { %871 = vperm.xlu0 %2298, %v2633_v41  }
  0xa1   : >> { %2263 = vset.pattern.permute.xlu1 %v3266_v52 }
  0xa2   : >> { %855 = vperm.xlu1 %2263, %v2596_v30  }
  0xa3   : >> { %875 = vperm.xlu0 %2298, %v2720_v53  }
  0xa6   : >> { %2264 = vset.pattern.permute.xlu1 %v2360_v40 }
  0xa7   : >> { %883 = vperm.xlu0 %2298, %v2685_v49   ;;  %397 = vperm.xlu1 %2264, %v2621_v36  }
  0xab   : >> { %2265 = vset.pattern.permute.xlu1 %v3265_v29 }
  0xac   : >> { %437 = vperm.xlu1 %2265, %v2720_v53  }
  0xb0   : >> { %v2729_v54 = vpop.permute.xlu1 %412  ;;  %2267 = vset.pattern.permute.xlu1 %v3274_v37 }
  0xb1   : >> { %v497_v55 = vpop.permute.xlu0 %496  ;;  %548 = vperm.xlu1 %2267, %v2720_v53  }
  0xb4   : >> { %v2733_v56 = vpop.permute.xlu1 %417 }
  0xb5   : >> { %v505_v57 = vpop.permute.xlu0 %504  ;;  %2268 = vset.pattern.permute.xlu1 %v3261_v44  ;;  %v2758_v44 = vld [vmem:[%s350_s19] sm:$0x1f] }
  0xb6   : >> { %621 = vperm.xlu1 %2268, %v2612_v34  }
  0xb9   : >> { %v2737_v58 = vpop.permute.xlu0 %512  ;;  %v2739_v59 = vpop.permute.xlu1 %500 }
  0xba   : >> { %2269 = vset.pattern.permute.xlu1 %v3270_v48 }
  0xbb   : >> { %726 = vperm.xlu1 %2269, %v2665_v46  }
  0xbd   : >> { %v2743_v60 = vpop.permute.xlu0 %516 }
  0xbe   : >> { %v529_v61 = vpop.permute.xlu1 %528 }
  0xbf   : >> { %v559_v62 = vsel %vm296_vm0, %v497_v55, %v529_v61  ;;  %2270 = vset.pattern.permute.xlu1 %v3263_v45  ;;  %v2761_v55 = vrot.slane %v2758_v44, %v460_v16  ;;  %v569_v45 = vsub.s32 1, %v2456_v7 }
  0xc0   : >> { %758 = vperm.xlu1 %2270, %v2627_v38  }
  0xc1   : >> { %v2772_v48 = vrot.slane %v2758_v44, %v569_v45 }
  0xc2   : >> { %v2750_v63 = vpop.permute.xlu0 %649 }
  0xc3   : >> { %v383_v0 = vpop.permute.xlu1 %382 }
  0xc4   : >> { %2271 = vset.pattern.permute.xlu1 %v3266_v52 }
  0xc5   : >> { %863 = vperm.xlu1 %2271, %v2638_v42  }
  0xc6   : >> { %v2756_v18 = vpop.permute.xlu0 %653 }
  0xc8   : >> { %v423_v61 = vpop.permute.xlu1 %422 }
  0xc9   : >> { %v452_v29 = vsel %vm296_vm0, %v383_v0, %v423_v61  ;;  %2272 = vset.pattern.permute.xlu1 %v2360_v40  ;;  %v2780_v61 = vstv %s2460_s15 }
  0xca   : >> { %402 = vperm.xlu1 %2272, %v2698_v50   ;;  %v464_v51 = vsub.f32 %v452_v29, %v2761_v55 }
  0xcb   : >> { %v2768_v52 = vpop.permute.xlu0 %442 }
  0xcc   : >> { %v472_v37 = vand.u32 2147483647, %v464_v51 }
  0xcd   : >> { %v537_v16 = vpop.permute.xlu1 %536 }
  0xce   : >> { %v561_v39 = vsel %vm296_vm0, %v505_v57, %v537_v16  ;;  %2275 = vset.pattern.permute.xlu1 %v3275_v28  ;;  %v481_v45 = vmul.f32 %v2780_v61, %v472_v37 }
  0xcf   : >> { %v573_v0 = vsub.f32 %v561_v39, %v2772_v48  ;;  %520 = vperm.xlu1 %2275, %v2698_v50  }
  0xd0   : >> { %v610_v40 = vpop.permute.xlu0 %609 }
  0xd1   : >> { %v581_v27 = vand.u32 2147483647, %v573_v0  ;;  %v3307_v0 = vmov 7  }
  0xd2   : >> { %v606_v29 = vpop.permute.xlu1 %605 }
  0xd3   : >> { %v590_v25 = vmul.f32 %v2783_v26, %v581_v27  ;;  %2276 = vset.pattern.permute.xlu1 %v3306_v24 }
  0xd4   : >> { %v2788_v57 = vpop.permute.xlu0 %625  ;;  %552 = vperm.xlu1 %2276, %v2642_v43  }
  0xd5   : >> { %v2791_v39 = vadd.f32 %v590_v25, %v481_v45  ;;  %v2803_v25 = vrot.slane %v2758_v44, %v678_v23  ;;  %v3308_v45 = vmov 3  }
  0xd7   : >> { %v638_v51 = vpop.permute.xlu1 %637 }
  0xd8   : >> { %v668_v16 = vsel %vm296_vm0, %v606_v29, %v638_v51  ;;  %2278 = vset.pattern.permute.xlu1 %v3307_v0  ;;  %v571_v29 = vsub.f32 %v559_v62, %v2772_v48  ;;  %v2816_v62 = vstv %s2467_s17 }
  0xd9   : >> { %v751_v28 = vpop.permute.xlu0 %750  ;;  %657 = vperm.xlu1 %2278, %v2720_v53   ;;  %v680_v21 = vsub.f32 %v668_v16, %v2803_v25 }
  0xda   : >> { %v579_v20 = vand.u32 2147483647, %v571_v29 }
  0xdb   : >> { %v642_v27 = vpop.permute.xlu1 %641  ;;  %v688_v12 = vand.u32 2147483647, %v680_v21 }
  0xdc   : >> { %v669_v24 = vsel %vm296_vm0, %v610_v40, %v642_v27  ;;  %v3309_v27 = vmov 4   ;;  %v588_v16 = vmul.f32 %v2783_v26, %v579_v20  ;;  %v787_v20 = vsub.s32 3, %v2456_v7 }
  0xdd   : >> { %v2800_v37 = vpop.permute.xlu0 %762  ;;  %2279 = vset.pattern.permute.xlu1 %v3308_v45 }
  0xde   : >> { %730 = vperm.xlu1 %2279, %v2612_v34  }
  0xe0   : >> { %v428_v51 = vpop.permute.xlu1 %427 }
  0xe2   : >> { %v373_v19 = vpop.permute.xlu0 %372  ;;  %2281 = vset.pattern.permute.xlu1 %v3309_v27 }
  0xe3   : >> { %v450_v40 = vsel %vm296_vm0, %v373_v19, %v2729_v54  ;;  %835 = vperm.xlu1 %2281, %v2665_v46   ;;  %v697_v19 = vmul.f32 %v2816_v62, %v688_v12 }
  0xe4   : >> { %v462_v23 = vsub.f32 %v450_v40, %v2761_v55 }
  0xe5   : >> { %v509_v14 = vpop.permute.xlu1 %508 }
  0xe6   : >> { %v470_v15 = vand.u32 2147483647, %v462_v23  ;;  %v378_v13 = vpop.permute.xlu0 %377  ;;  %v3311_v23 = vmov 5  }
  0xe7   : >> { %2282 = vset.pattern.permute.xlu1 %v3310_v10  ;;  %v451_v21 = vsel %vm296_vm0, %v378_v13, %v2733_v56  ;;  %v3313_v13 = vmov 1   ;;  %v681_v56 = vsub.f32 %v669_v24, %v2803_v25 }
  0xe8   : >> { %v479_v11 = vmul.f32 %v2780_v61, %v470_v15  ;;  %867 = vperm.xlu1 %2282, %v2627_v38   ;;  %v463_v22 = vsub.f32 %v451_v21, %v2761_v55 }
  0xea   : >> { %v596_v54 = vadd.f32 %v588_v16, %v479_v11  ;;  %v388_v29 = vpop.permute.xlu0 %387  ;;  %v614_v40 = vpop.permute.xlu1 %613  ;;  %v471_v21 = vand.u32 2147483647, %v463_v22 }
  0xeb   : >> { %v453_v16 = vsel %vm296_vm0, %v388_v29, %v428_v51 }
  0xec   : >> { %v2823_v9 = vadd.f32 %v697_v19, %v596_v54  ;;  %2284 = vset.pattern.permute.xlu1 %v3311_v23  ;;  %v2843_v23 = vrot.slane %v2758_v44, %v787_v20  ;;  %v465_v51 = vsub.f32 %v453_v16, %v2761_v55 }
  0xed   : >> { %447 = vperm.xlu1 %2284, %v2685_v49  }
  0xee   : >> { %v2830_v15 = vpop.permute.xlu0 %407 }
  0xef   : >> { %3312 = vst [vmem:[#allocation23_spill] sm:$0xff] %v2830_v15  ;;  %v646_v12 = vpop.permute.xlu1 %645 }
  0xf0   : >> { %v670_v11 = vsel %vm296_vm0, %v614_v40, %v646_v12 }
  0xf1   : >> { %v682_v19 = vsub.f32 %v670_v11, %v2803_v25  ;;  %2285 = vset.pattern.permute.xlu1 %v3313_v13  ;;  %v689_v13 = vand.u32 2147483647, %v681_v56 }
  0xf2   : >> { %524 = vperm.xlu1 %2285, %v2674_v47  }
  0xf3   : >> { %v533_v54 = vpop.permute.xlu0 %532  ;;  %v690_v15 = vand.u32 2147483647, %v682_v19  ;;  %v3314_v19 = vmov 2  }
  0xf4   : >> { %v560_v40 = vsel %vm296_vm0, %v2739_v59, %v533_v54  ;;  %v719_v12 = vpop.permute.xlu1 %718  ;;  %v480_v59 = vmul.f32 %v2780_v61, %v471_v21 }
  0xf5   : >> { %v572_v29 = vsub.f32 %v560_v40, %v2772_v48  ;;  %v699_v24 = vmul.f32 %v2816_v62, %v690_v15  ;;  %v778_v11 = vsel %vm296_vm0, %v719_v12, %v751_v28  ;;  %v473_v15 = vand.u32 2147483647, %v465_v51 }
  0xf6   : >> { %v790_v22 = vsub.f32 %v778_v11, %v2843_v23  ;;  %2287 = vset.pattern.permute.xlu1 %v3314_v19  ;;  %v698_v11 = vmul.f32 %v2816_v62, %v689_v13 }
  0xf7   : >> { %v580_v20 = vand.u32 2147483647, %v572_v29  ;;  %v541_v6 = vpop.permute.xlu0 %540  ;;  %v2857_v16 = vadd.f32 %v699_v24, %v2791_v39  ;;  %629 = vperm.xlu1 %2287, %v2698_v50   ;;  %v2865_v29 = vstv %s2499_s29 }
  0xf8   : >> { %v562_v54 = vsel %vm296_vm0, %v509_v14, %v541_v6  ;;  %v798_v56 = vand.u32 2147483647, %v790_v22  ;;  %v482_v6 = vmul.f32 %v2780_v61, %v473_v15 }
  0xf9   : >> { %v589_v28 = vmul.f32 %v2783_v26, %v580_v20  ;;  %v574_v40 = vsub.f32 %v562_v54, %v2772_v48  ;;  %v747_v12 = vpop.permute.xlu1 %746 }
  0xfa   : >> { %v807_v51 = vmul.f32 %v2865_v29, %v798_v56 }
  0xfb   : >> { %v597_v21 = vadd.f32 %v589_v28, %v480_v59  ;;  %v582_v5 = vand.u32 2147483647, %v574_v40  ;;  %v2868_v39 = vpop.permute.xlu0 %556  ;;  %2288 = vset.pattern.permute.xlu1 %v3307_v0  ;;  %v3315_v28 = vmov 8  }
  0xfc   : >> { %661 = vperm.xlu1 %2288, %v2642_v43  }
  0xfd   : >> { %v706_v14 = vadd.f32 %v698_v11, %v597_v21  ;;  %v591_v24 = vmul.f32 %v2783_v26, %v582_v5 }
  0xfe   : >> { %v393_v54 = vpop.permute.xlu1 %392 }
  0xff   : >> { %v2875_v20 = vadd.f32 %v807_v51, %v706_v14  ;;  %v599_v22 = vadd.f32 %v591_v24, %v482_v6 }
 0x100   : >> { %v715_v13 = vpop.permute.xlu0 %714  ;;  %2289 = vset.pattern.permute.xlu1 %v3315_v28 }
 0x101   : >> { %v777_v59 = vsel %vm296_vm0, %v715_v13, %v747_v12  ;;  %766 = vperm.xlu1 %2289, %v2720_v53  }
 0x102   : >> { %v789_v40 = vsub.f32 %v777_v59, %v2843_v23 }
 0x103   : >> { %v433_v56 = vpop.permute.xlu1 %432 }
 0x104   : >> { %v797_v15 = vand.u32 2147483647, %v789_v40  ;;  %v2882_v11 = vpop.permute.xlu0 %734  ;;  %v454_v5 = vsel %vm296_vm0, %v393_v54, %v433_v56 }
 0x105   : >> { %2290 = vset.pattern.permute.xlu1 %v3309_v27  ;;  %v466_v6 = vsub.f32 %v454_v5, %v2761_v55 }
 0x106   : >> { %v806_v21 = vmul.f32 %v2865_v29, %v797_v15  ;;  %839 = vperm.xlu1 %2290, %v2612_v34  }
 0x107   : >> { %v474_v13 = vand.u32 2147483647, %v466_v6 }
 0x108   : >> { %v814_v12 = vadd.f32 %v806_v21, %v2823_v9  ;;  %v2891_v14 = vpop.permute.xlu0 %738  ;;  %v545_v51 = vpop.permute.xlu1 %544 }
 0x109   : >> { %v563_v24 = vsel %vm296_vm0, %v2737_v58, %v545_v51  ;;  %v483_v56 = vmul.f32 %v2780_v61, %v474_v13 }
 0x10a   : >> { %v575_v54 = vsub.f32 %v563_v24, %v2772_v48  ;;  %2291 = vset.pattern.permute.xlu1 %v3314_v19 }
 0x10b   : >> { %633 = vperm.xlu1 %2291, %v2674_v47  }
 0x10c   : >> { %v583_v59 = vand.u32 2147483647, %v575_v54 }
 0x10d   : >> { %v824_v40 = vpop.permute.xlu0 %823  ;;  %v618_v15 = vpop.permute.xlu1 %617 }
 0x10e   : >> { %v592_v9 = vmul.f32 %v2783_v26, %v583_v59  ;;  %v671_v5 = vsel %vm296_vm0, %v618_v15, %v2750_v63  ;;  %v896_v63 = vsub.s32 4, %v2456_v7 }
 0x10f   : >> { %v683_v58 = vsub.f32 %v671_v5, %v2803_v25  ;;  %2292 = vset.pattern.permute.xlu1 %v3307_v0 }
 0x110   : >> { %v2906_v21 = vadd.f32 %v592_v9, %v483_v56  ;;  %665 = vperm.xlu1 %2292, %v2685_v49   ;;  %v2925_v9 = vrot.slane %v2758_v44, %v896_v63 }
 0x111   : >> { %v2909_v19 = vpop.permute.xlu0 %831  ;;  %v691_v6 = vand.u32 2147483647, %v683_v58 }
 0x112   : >> { %v723_v51 = vpop.permute.xlu1 %722 }
 0x113   : >> { %v700_v24 = vmul.f32 %v2816_v62, %v691_v6 }
 0x114   : >> { %2294 = vset.pattern.permute.xlu1 %v3315_v28 }
 0x115   : >> { %v2913_v13 = vpop.permute.xlu0 %847  ;;  %v2915_v54 = vadd.f32 %v700_v24, %v599_v22  ;;  %770 = vperm.xlu1 %2294, %v2642_v43  }
 0x117   : >> { %v755_v0 = vpop.permute.xlu1 %754 }
 0x118   : >> { %v779_v59 = vsel %vm296_vm0, %v723_v51, %v755_v0  ;;  %v2936_v0 = vstv %s2525_s27 }
 0x119   : >> { %v791_v15 = vsub.f32 %v779_v59, %v2843_v23  ;;  %2295 = vset.pattern.permute.xlu1 %v3309_v27 }
 0x11a   : >> { %843 = vperm.xlu1 %2295, %v2621_v36   ;;  %v860_v56 = vpop.permute.xlu0 %859 }
 0x11b   : >> { %v799_v22 = vand.u32 2147483647, %v791_v15 }
 0x11c   : >> { %v828_v5 = vpop.permute.xlu1 %827 }
 0x11d   : >> { %v808_v58 = vmul.f32 %v2865_v29, %v799_v22  ;;  %v887_v6 = vsel %vm296_vm0, %v828_v5, %v860_v56 }
 0x11e   : >> { %v899_v24 = vsub.f32 %v887_v6, %v2925_v9  ;;  %2296 = vset.pattern.permute.xlu1 %v3308_v45 }
 0x11f   : >> { %v2933_v51 = vadd.f32 %v808_v58, %v2857_v16  ;;  %742 = vperm.xlu1 %2296, %v2674_v47  }
 0x120   : >> { %v907_v44 = vand.u32 2147483647, %v899_v24 }
 0x121   : >> { %v856_v63 = vpop.permute.xlu1 %855 }
 0x122   : >> { %v916_v59 = vmul.f32 %v2936_v0, %v907_v44  ;;  %v886_v15 = vsel %vm296_vm0, %v824_v40, %v856_v63 }
 0x123   : >> { %v898_v56 = vsub.f32 %v886_v15, %v2925_v9  ;;  %2297 = vset.pattern.permute.xlu1 %v3315_v28 }
 0x124   : >> { %v924_v45 = vadd.f32 %v916_v59, %v2875_v20  ;;  %774 = vperm.xlu1 %2297, %v2685_v49  }
 0x125   : >> { %v906_v16 = vand.u32 2147483647, %v898_v56 }
 0x126   : >> { %v932_v22 = vmax.f32 %v924_v45, 0.0  ;;  %v398_v5 = vpop.permute.xlu1 %397 }
 0x127   : >> { %v915_v58 = vmul.f32 %v2936_v0, %v906_v16 }
 0x128   : >> { %v940_v6 = vsub.f32 0.0, %v932_v22  ;;  %2299 = vset.pattern.permute.xlu1 %v3310_v10 }
 0x129   : >> { %v923_v24 = vadd.f32 %v915_v58, %v814_v12  ;;  %879 = vperm.xlu1 %2299, %v2642_v43  }
 0x12a   : >> { %v949_v40 = vmul.f32 1.442695, %v940_v6 }
 0x12b   : >> { %v931_v44 = vmax.f32 %v923_v24, 0.0  ;;  %v438_v63 = vpop.permute.xlu1 %437 }
 0x12c   : >> { %v455_v28 = vsel %vm296_vm0, %v398_v5, %v438_v63  ;;  %2301 = vpow2.f32 %v949_v40 }
 0x12d   : >> { %v939_v20 = vsub.f32 0.0, %v931_v44  ;;  %2300 = vset.pattern.permute.xlu1 %v3309_v27  ;;  %v467_v59 = vsub.f32 %v455_v28, %v2761_v55 }
 0x12e   : >> { %851 = vperm.xlu1 %2300, %v2674_v47  }
 0x12f   : >> { %v947_v15 = vmul.f32 1.442695, %v939_v20  ;;  %v475_v12 = vand.u32 2147483647, %v467_v59 }
 0x130   : >> { %v549_v56 = vpop.permute.xlu1 %548 }
 0x131   : >> { %2303 = vpow2.f32 %v947_v15  ;;  %v564_v10 = vsel %vm296_vm0, %v2743_v60, %v549_v56  ;;  %v484_v5 = vmul.f32 %v2780_v61, %v475_v12 }
 0x132   : >> { %v576_v45 = vsub.f32 %v564_v10, %v2772_v48 }
 0x134   : >> { %v584_v16 = vand.u32 2147483647, %v576_v45 }
 0x135   : >> { %v622_v22 = vpop.permute.xlu1 %621 }
 0x136   : >> { %v593_v27 = vmul.f32 %v2783_v26, %v584_v16  ;;  %v672_v58 = vsel %vm296_vm0, %v622_v22, %v2756_v18  ;;  %v2302_v40 = vpop.eup %2301 }
 0x137   : >> { %v684_v6 = vsub.f32 %v672_v58, %v2803_v25  ;;  %v2969_v20 = vsel %vm315_vm10, %v2302_v40, 0.0 }
 0x138   : >> { %v2964_v24 = vadd.f32 %v593_v27, %v484_v5 }
 0x139   : >> { %v692_v44 = vand.u32 2147483647, %v684_v6  ;;  %v2104_v6 = vpack.c.bf16 %v2615_v35, %v2599_v31 }
 0x13a   : >> { %v727_v60 = vpop.permute.xlu1 %726 }
 0x13b   : >> { %v2304_v63 = vpop.eup %2303  ;;  %v701_v28 = vmul.f32 %v2816_v62, %v692_v44  ;;  %2105 = vmatprep.subr.bf16.mxu0 %v2104_v6  ;;  %v3336_v44 = vld [vmem:[#allocation22_spill] sm:$0xff] }
 0x13c   : >> { %v2973_v59 = vsel %vm315_vm10, %v2304_v63, 0.0  ;;  %2107 = vmatpush3.bf16.msra.mxu0 %v2104_v6 }
 0x13d   : >> { %v2976_v18 = vadd.f32 %v701_v28, %v2906_v21  ;;  %v2980_v15 = vadd.f32 %v2969_v20, %v2973_v59  ;;  %v1035_v28 = vadd.f32 %v2604_v32, %v2615_v35 }
 0x13f   : >> { %v759_v56 = vpop.permute.xlu1 %758 }
 0x140   : >> { %v780_v10 = vsel %vm296_vm0, %v727_v60, %v759_v56  ;;  %v2142_v60 = vpack.c.bf16 %v2434_v2, %v2429_v1 }
 0x141   : >> { %v792_v12 = vsub.f32 %v780_v10, %v2843_v23  ;;  %v1036_v10 = vadd.f32 %v2638_v42, %v2607_v33 }
 0x142   : >> { %2144 = vmatprep.subr.msk.bf16.mxu1 %vm2995_vm14, %v2142_v60 }
 0x143   : >> { %v800_v45 = vand.u32 2147483647, %v792_v12  ;;  %2147 = vmatpush3.bf16.msk.msra.mxu1 %vm2995_vm14, %v2142_v60 }
 0x144   : >> { %v864_v16 = vpop.permute.xlu1 %863  ;;  %2149 = vmatprep.subr.bf16.mxu1 %v2104_v6 }
 0x145   : >> { %v809_v22 = vmul.f32 %v2865_v29, %v800_v45  ;;  %v888_v5 = vsel %vm296_vm0, %v2909_v19, %v864_v16  ;;  %v2108_v19 = vpack.c.bf16 %v2665_v46, %v2607_v33 }
 0x146   : >> { %v900_v21 = vsub.f32 %v888_v5, %v2925_v9 }
 0x147   : >> { %v2991_v27 = vadd.f32 %v809_v22, %v2915_v54  ;;  %v1034_v54 = vadd.f32 %v2596_v30, %v2599_v31  ;;  %2109 = vmatprep.subr.bf16.mxu0 %v2108_v19  ;;  %v2112_v31 = vpack.c.bf16 %v2621_v36, %v2612_v34  ;;  %v2116_v22 = vpack.c.bf16 %v2674_v47, %v2698_v50 }
 0x148   : >> { %v908_v58 = vand.u32 2147483647, %v900_v21  ;;  %2111 = vmatpush3.bf16.msra.mxu0 %v2108_v19 }
 0x149   : >> { %v403_v40 = vpop.permute.xlu1 %402  ;;  %2032 = vmatprep.mubr.msk.f32.mxu1 %vm1147_vm15, %v1034_v54  ;;  %2113 = vmatprep.subr.bf16.mxu0 %v2112_v31 }
 0x14a   : >> { %v917_v63 = vmul.f32 %v2936_v0, %v908_v58  ;;  %v456_v35 = vsel %vm296_vm0, %v403_v40, %v2768_v52  ;;  %2033 = vmatmul.mubr.msk.f32.vlgmr.msra.gmra.mrb[0].mxu1 %vm1147_vm15, %v1035_v28  ;;  %v1038_v52 = vadd.f32 %v2633_v41, %v2612_v34 }
 0x14b   : >> { %2151 = vmatpush3.bf16.msra.mxu1 %v2104_v6  ;;  %v468_v33 = vsub.f32 %v456_v35, %v2761_v55  ;;  %2035 = vmatprep.mubr.msk.f32.mxu1 %vm1147_vm15, %v1036_v10  ;;  %v2120_v6 = vpack.c.bf16 %v2604_v32, %v2596_v30 }
 0x14c   : >> { %v925_v56 = vadd.f32 %v917_v63, %v2933_v51  ;;  %v1037_v51 = vadd.f32 %v2627_v38, %v2665_v46  ;;  %2153 = vmatprep.subr.bf16.mxu1 %v2108_v19  ;;  %2115 = vmatpush3.bf16.msra.mxu0 %v2112_v31  ;;  %v1039_v46 = vadd.f32 %v2720_v53, %v2621_v36 }
 0x14d   : >> { %2117 = vmatprep.subr.bf16.mxu0 %v2116_v22  ;;  %v476_v40 = vand.u32 2147483647, %v468_v33  ;;  %v2128_v63 = vpack.c.bf16 %v2720_v53, %v2633_v41 }
 0x14e   : >> { %v933_v12 = vmax.f32 %v925_v56, 0.0  ;;  %v521_v45 = vpop.permute.xlu1 %520  ;;  %2036 = vmatmul.mubr.msk.f32.gmra.mrb[2].mxu1 %vm1147_vm15, %v1037_v51 }
 0x14f   : >> { %2155 = vmatpush3.bf16.msra.mxu1 %v2108_v19  ;;  %2038 = vmatprep.mubr.msk.f32.mxu1 %vm1147_vm15, %v1038_v52  ;;  %v2124_v19 = vpack.c.bf16 %v2627_v38, %v2638_v42  ;;  %v485_v54 = vmul.f32 %v2780_v61, %v476_v40  ;;  %v2132_v38 = vpack.c.bf16 %v2685_v49, %v2642_v43 }
 0x150   : >> { %v941_v16 = vsub.f32 0.0, %v933_v12  ;;  %2157 = vmatprep.subr.bf16.mxu1 %v2112_v31  ;;  %2119 = vmatpush3.bf16.msra.mxu0 %v2116_v22 }
 0x151   : >> { %2121 = vmatprep.subr.bf16.mxu0 %v2120_v6 }
 0x152   : >> { %v951_v5 = vmul.f32 1.442695, %v941_v16  ;;  %2039 = vmatmul.mubr.msk.f32.gmra.mrb[4].mxu1 %vm1147_vm15, %v1039_v46 }
 0x153   : >> { %v553_v21 = vpop.permute.xlu1 %552  ;;  %2159 = vmatpush3.bf16.msra.mxu1 %v2112_v31 }
 0x154   : >> { %2305 = vpow2.f32 %v951_v5  ;;  %v565_v58 = vsel %vm296_vm0, %v521_v45, %v553_v21  ;;  %2161 = vmatprep.subr.bf16.mxu1 %v2116_v22  ;;  %2123 = vmatpush3.bf16.msra.mxu0 %v2120_v6 }
 0x155   : >> { %v577_v34 = vsub.f32 %v565_v58, %v2772_v48  ;;  %2125 = vmatprep.subr.bf16.mxu0 %v2124_v19 }
 0x157   : >> { %v585_v60 = vand.u32 2147483647, %v577_v34  ;;  %2163 = vmatpush3.bf16.msra.mxu1 %v2116_v22 }
 0x158   : >> { %v3040_v36 = vpop.permute.xlu1 %657  ;;  %2165 = vmatprep.subr.bf16.mxu1 %v2120_v6  ;;  %2127 = vmatpush3.bf16.msra.mxu0 %v2124_v19 }
 0x159   : >> { %v594_v30 = vmul.f32 %v2783_v26, %v585_v60  ;;  %2129 = vmatprep.subr.bf16.mxu0 %v2128_v63  ;;  %v872_v60 = vpop.permute.xlu0 %871 }
 0x15b   : >> { %v3046_v32 = vadd.f32 %v594_v30, %v485_v54  ;;  %2167 = vmatpush3.bf16.msra.mxu1 %v2120_v6 }
 0x15c   : >> { %2169 = vmatprep.subr.bf16.mxu1 %v2124_v19  ;;  %2131 = vmatpush3.bf16.msra.mxu0 %v2128_v63 }
 0x15d   : >> { %v731_v28 = vpop.permute.xlu1 %730  ;;  %2133 = vmatprep.subr.bf16.mxu0 %v2132_v38 }
 0x15e   : >> { %v2306_v56 = vpop.eup %2305  ;;  %v781_v46 = vsel %vm296_vm0, %v731_v28, %v2800_v37 }
 0x15f   : >> { %v3052_v31 = vsel %vm315_vm10, %v2306_v56, 0.0  ;;  %2171 = vmatpush3.bf16.msra.mxu1 %v2124_v19  ;;  %v793_v58 = vsub.f32 %v781_v46, %v2843_v23  ;;  %v1041_v56 = vadd.f32 %v2685_v49, %v2674_v47  ;;  %v3319_v46 = vld [vmem:[#allocation6_spill] sm:$0xff] }
 0x160   : >> { %v972_v42 = vadd.f32 %v2980_v15, %v3052_v31  ;;  %2173 = vmatprep.subr.bf16.mxu1 %v2128_v63  ;;  %2135 = vmatpush3.bf16.msra.mxu0 %v2132_v38 }
 0x162   : >> { %v836_v10 = vpop.permute.xlu1 %835 }
 0x163   : >> { %2175 = vmatpush3.bf16.msra.mxu1 %v2128_v63  ;;  %v1040_v63 = vadd.f32 %v2642_v43, %v2698_v50  ;;  %v673_v43 = vsel %vm296_vm0, %v2788_v57, %v3040_v36  ;;  %v3097_v57 = vpack.c.bf16 %v2444_v4, %v2439_v3  ;;  %v3318_v36 = vld [vmem:[#allocation5_spill] sm:$0xff] }
 0x164   : >> { %2177 = vmatprep.subr.bf16.mxu1 %v2132_v38  ;;  %v685_v49 = vsub.f32 %v673_v43, %v2803_v25  ;;  %v3320_v43 = vld [vmem:[#allocation23_spill] sm:$0xff] }
 0x165   : >> { %2041 = vmatprep.mubr.msk.f32.mxu1 %vm1147_vm15, %v1040_v63  ;;  %2138 = vmatprep.subr.msk.bf16.mxu0 %vm2995_vm14, %v3097_v57 }
 0x166   : >> { %2042 = vmatmul.mubr.msk.f32.gmra.mrb[6].mxu1 %vm1147_vm15, %v1041_v56 }
 0x167   : >> { %v868_v41 = vpop.permute.xlu1 %867  ;;  %2179 = vmatpush3.bf16.msra.mxu1 %v2132_v38 }
 0x168   : >> { %v889_v53 = vsel %vm296_vm0, %v836_v10, %v868_v41 }
 0x169   : >> { %v901_v12 = vsub.f32 %v889_v53, %v2925_v9 }
 0x16b   : >> { %v909_v35 = vand.u32 2147483647, %v901_v12 }
 0x16c   : >> { %v3061_v45 = vpop.permute.xlu1 %447 }
 0x16d   : >> { %v918_v15 = vmul.f32 %v2936_v0, %v909_v35 }
 0x16f   : >> { %v926_v51 = vadd.f32 %v918_v15, %v2991_v27  ;;  %v801_v27 = vand.u32 2147483647, %v793_v58  ;;  %v3101_v58 = vpack.c.bf16 %v3319_v46, %v3318_v36 }
 0x171   : >> { %v934_v16 = vmax.f32 %v926_v51, 0.0  ;;  %v525_v22 = vpop.permute.xlu1 %524  ;;  %v810_v37 = vmul.f32 %v2865_v29, %v801_v27  ;;  %2182 = vmatprep.subr.msk.bf16.mxu1 %vm2995_vm14, %v3101_v58 }
 0x173   : >> { %v942_v33 = vsub.f32 0.0, %v934_v16  ;;  %v818_v10 = vadd.f32 %v810_v37, %v2976_v18  ;;  %v693_v16 = vand.u32 2147483647, %v685_v49 }
 0x175   : >> { %v953_v52 = vmul.f32 1.442695, %v942_v33 }
 0x176   : >> { %v630_v5 = vpop.permute.xlu1 %629 }
 0x177   : >> { %2307 = vpow2.f32 %v953_v52  ;;  %v876_v52 = vpop.permute.xlu0 %875 }
 0x17b   : >> { %v662_v21 = vpop.permute.xlu1 %661 }
 0x180   : >> { %v767_v6 = vpop.permute.xlu1 %766 }
 0x181   : >> { %v2308_v40 = vpop.eup %2307  ;;  %v782_v47 = vsel %vm296_vm0, %v2882_v11, %v767_v6  ;;  %v702_v11 = vmul.f32 %v2816_v62, %v693_v16 }
 0x182   : >> { %v3071_v34 = vsel %vm315_vm10, %v2308_v40, 0.0  ;;  %v794_v15 = vsub.f32 %v782_v47, %v2843_v23 }
 0x183   : >> { %v973_v19 = vadd.f32 %v972_v42, %v3071_v34 }
 0x184   : >> { %v802_v33 = vand.u32 2147483647, %v794_v15 }
 0x185   : >> { %v840_v54 = vpop.permute.xlu1 %839 }
 0x186   : >> { %v890_v30 = vsel %vm296_vm0, %v840_v54, %v872_v60  ;;  %v811_v27 = vmul.f32 %v2865_v29, %v802_v33  ;;  %v710_v54 = vadd.f32 %v702_v11, %v2964_v24 }
 0x187   : >> { %v902_v28 = vsub.f32 %v890_v30, %v2925_v9  ;;  %v674_v30 = vsel %vm296_vm0, %v630_v5, %v662_v21 }
 0x188   : >> { %v819_v56 = vadd.f32 %v811_v27, %v710_v54  ;;  %v884_v54 = vpop.permute.xlu0 %883 }
 0x189   : >> { %v910_v38 = vand.u32 2147483647, %v902_v28 }
 0x18a   : >> { %v634_v42 = vpop.permute.xlu1 %633 }
 0x18b   : >> { %v919_v41 = vmul.f32 %v2936_v0, %v910_v38 }
 0x18d   : >> { %v927_v53 = vadd.f32 %v919_v41, %v818_v10  ;;  %v566_v41 = vsel %vm296_vm0, %v525_v22, %v2868_v39 }
 0x18e   : >> { %v578_v39 = vsub.f32 %v566_v41, %v2772_v48 }
 0x18f   : >> { %v935_v50 = vmax.f32 %v927_v53, 0.0  ;;  %v666_v12 = vpop.permute.xlu1 %665  ;;  %v686_v53 = vsub.f32 %v674_v30, %v2803_v25 }
 0x191   : >> { %v943_v35 = vsub.f32 0.0, %v935_v50  ;;  %v675_v50 = vsel %vm296_vm0, %v634_v42, %v666_v12 }
 0x193   : >> { %v955_v18 = vmul.f32 1.442695, %v943_v35  ;;  %v694_v35 = vand.u32 2147483647, %v686_v53 }
 0x194   : >> { %v771_v51 = vpop.permute.xlu1 %770 }
 0x195   : >> { %2309 = vpow2.f32 %v955_v18  ;;  %v783_v38 = vsel %vm296_vm0, %v2891_v14, %v771_v51  ;;  %v457_v14 = vsel %vm296_vm0, %v3320_v43, %v3061_v45  ;;  %v687_v18 = vsub.f32 %v675_v50, %v2803_v25 }
 0x196   : >> { %v795_v47 = vsub.f32 %v783_v38, %v2843_v23  ;;  %v586_v45 = vand.u32 2147483647, %v578_v39  ;;  %v703_v12 = vmul.f32 %v2816_v62, %v694_v35 }
 0x197   : >> { %v695_v36 = vand.u32 2147483647, %v687_v18 }
 0x198   : >> { %v803_v16 = vand.u32 2147483647, %v795_v47  ;;  %v595_v11 = vmul.f32 %v2783_v26, %v586_v45 }
 0x199   : >> { %v844_v6 = vpop.permute.xlu1 %843 }
 0x19a   : >> { %v891_v40 = vsel %vm296_vm0, %v844_v6, %v876_v52 }
 0x19b   : >> { %v903_v60 = vsub.f32 %v891_v40, %v2925_v9  ;;  %v711_v40 = vadd.f32 %v703_v12, %v3046_v32 }
 0x19d   : >> { %v911_v63 = vand.u32 2147483647, %v903_v60  ;;  %v704_v60 = vmul.f32 %v2816_v62, %v695_v36 }
 0x19e   : >> { %v743_v37 = vpop.permute.xlu1 %742 }
 0x19f   : >> { %v2310_v28 = vpop.eup %2309  ;;  %v920_v10 = vmul.f32 %v2936_v0, %v911_v63 }
 0x1a0   : >> { %v3127_v24 = vsel %vm315_vm10, %v2310_v28, 0.0 }
 0x1a1   : >> { %v928_v5 = vadd.f32 %v920_v10, %v819_v56  ;;  %v974_v21 = vadd.f32 %v973_v19, %v3127_v24  ;;  %v469_v19 = vsub.f32 %v457_v14, %v2761_v55  ;;  %v812_v55 = vmul.f32 %v2865_v29, %v803_v16 }
 0x1a3   : >> { %v936_v22 = vmax.f32 %v928_v5, 0.0  ;;  %v775_v49 = vpop.permute.xlu1 %774  ;;  %v477_v48 = vand.u32 2147483647, %v469_v19  ;;  %v820_v63 = vadd.f32 %v812_v55, %v711_v40 }
 0x1a4   : >> { %v784_v15 = vsel %vm296_vm0, %v743_v37, %v775_v49 }
 0x1a5   : >> { %v944_v51 = vsub.f32 0.0, %v936_v22  ;;  %v796_v42 = vsub.f32 %v784_v15, %v2843_v23  ;;  %v486_v27 = vmul.f32 %v2780_v61, %v477_v48 }
 0x1a7   : >> { %v957_v33 = vmul.f32 1.442695, %v944_v51  ;;  %v804_v6 = vand.u32 2147483647, %v796_v42  ;;  %v603_v28 = vadd.f32 %v595_v11, %v486_v27 }
 0x1a8   : >> { %v880_v52 = vpop.permute.xlu1 %879 }
 0x1a9   : >> { %2311 = vpow2.f32 %v957_v33  ;;  %v892_v46 = vsel %vm296_vm0, %v2913_v13, %v880_v52  ;;  %v813_v56 = vmul.f32 %v2865_v29, %v804_v6  ;;  %v712_v32 = vadd.f32 %v704_v60, %v603_v28 }
 0x1aa   : >> { %v904_v25 = vsub.f32 %v892_v46, %v2925_v9 }
 0x1ab   : >> { %v821_v53 = vadd.f32 %v813_v56, %v712_v32 }
 0x1ac   : >> { %v912_v23 = vand.u32 2147483647, %v904_v25 }
 0x1ad   : >> { %v852_v30 = vpop.permute.xlu1 %851 }
 0x1ae   : >> { %v921_v37 = vmul.f32 %v2936_v0, %v912_v23  ;;  %v893_v13 = vsel %vm296_vm0, %v852_v30, %v884_v54 }
 0x1af   : >> { %v905_v26 = vsub.f32 %v893_v13, %v2925_v9 }
 0x1b0   : >> { %v929_v38 = vadd.f32 %v921_v37, %v820_v63 }
 0x1b1   : >> { %v913_v10 = vand.u32 2147483647, %v905_v26 }
 0x1b2   : >> { %v937_v41 = vmax.f32 %v929_v38, 0.0 }
 0x1b3   : >> { %v2312_v61 = vpop.eup %2311  ;;  %v922_v62 = vmul.f32 %v2936_v0, %v913_v10 }
 0x1b4   : >> { %v968_v5 = vsel %vm315_vm10, %v2312_v61, 0.0  ;;  %v945_v43 = vsub.f32 0.0, %v937_v41 }
 0x1b5   : >> { %v930_v14 = vadd.f32 %v922_v62, %v821_v53  ;;  %v975_v50 = vadd.f32 %v974_v21, %v968_v5 }
 0x1b6   : >> { %v959_v47 = vmul.f32 1.442695, %v945_v43 }
 0x1b7   : >> { %v938_v39 = vmax.f32 %v930_v14, 0.0 }
 0x1b8   : >> { %2313 = vpow2.f32 %v959_v47 }
 0x1b9   : >> { %v946_v29 = vsub.f32 0.0, %v938_v39 }
 0x1bb   : >> { %v961_v22 = vmul.f32 1.442695, %v946_v29 }
 0x1bd   : >> { %2315 = vpow2.f32 %v961_v22 }
 0x1c2   : >> { %v2314_v9 = vpop.eup %2313 }
 0x1c3   : >> { %v969_v49 = vsel %vm315_vm10, %v2314_v9, 0.0 }
 0x1c4   : >> { %v976_v0 = vadd.f32 %v975_v50, %v969_v49 }
 0x1c7   : >> { %v2316_v35 = vpop.eup %2315 }
 0x1c8   : >> { %v970_v19 = vsel %vm2555_vm11, %v2316_v35, 0.0 }
 0x1c9   : >> { %v977_v18 = vadd.f32 %v976_v0, %v970_v19 }
 0x1cb   : >> { %v978_v21 = vrot.slane %v977_v18, 4 }
 0x1cd   : >> { %v979_v51 = vadd.f32 %v978_v21, %v977_v18 }
 0x1cf   : >> { %v980_v16 = vrot.slane %v979_v51, 2 }
 0x1d1   : >> { %v981_v45 = vadd.f32 %v980_v16, %v979_v51 }
 0x1d3   : >> { %v982_v33 = vrot.slane %v981_v45, 1 }
 0x1d5   : >> { %v983_v42 = vadd.f32 %v982_v33, %v981_v45 }
 0x1d7   : >> { %v984_v12 = vmax.f32 %v983_v42, 1e-12 }
 0x1d9   : >> { %2317 = vrcp.f32 %v984_v12 }
 0x1e3   : >> { %v2318_v52 = vpop.eup %2317 }
 0x1e4   : >> { %v986_v48 = vmul.f32 %v2318_v52, %v2973_v59  ;;  %v987_v36 = vmul.f32 %v2318_v52, %v2969_v20  ;;  %v988_v46 = vmul.f32 %v2318_v52, %v3052_v31  ;;  %v989_v55 = vmul.f32 %v2318_v52, %v3071_v34 }
 0x1e5   : >> { %v990_v25 = vmul.f32 %v2318_v52, %v3127_v24  ;;  %v991_v11 = vmul.f32 %v2318_v52, %v968_v5  ;;  %v992_v6 = vmul.f32 %v2318_v52, %v969_v49  ;;  %v993_v40 = vmul.f32 %v2318_v52, %v970_v19  ;;  %v3329_v52 = vld [vmem:[#allocation15_spill] sm:$0xff] }
 0x1e6   : >> { %996 = vst [vmem:[%s995_s21] sm:$0xff] %v986_v48  ;;  %997 = vst [vmem:[%s995_s21 + $0x8] sm:$0xff] %v987_v36  ;;  %v1004_v23 = vadd.f32 %v987_v36, %v986_v48 }
 0x1e7   : >> { %998 = vst [vmem:[%s995_s21 + $0x10] sm:$0xff] %v988_v46  ;;  %999 = vst [vmem:[%s995_s21 + $0x18] sm:$0xff] %v989_v55 }
 0x1e8   : >> { %1000 = vst [vmem:[%s995_s21 + $0x20] sm:$0xff] %v990_v25  ;;  %1001 = vst [vmem:[%s995_s21 + $0x28] sm:$0xff] %v991_v11  ;;  %v1005_v59 = vadd.f32 %v1004_v23, %v988_v46 }
 0x1e9   : >> { %1002 = vst [vmem:[%s995_s21 + $0x30] sm:$0xff] %v992_v6  ;;  %1003 = vst [vmem:[%s995_s21 + $0x38] sm:$0xff] %v993_v40 }
 0x1ea   : >> { %v1006_v20 = vadd.f32 %v1005_v59, %v989_v55 }
 0x1ec   : >> { %v1007_v27 = vadd.f32 %v1006_v20, %v990_v25 }
 0x1ee   : >> { %v1008_v31 = vadd.f32 %v1007_v27, %v991_v11 }
 0x1f0   : >> { %v1009_v60 = vadd.f32 %v1008_v31, %v992_v6  ;;  %v3333_v31 = vld [vmem:[#allocation19_spill] sm:$0xff] }
 0x1f2   : >> { %v1010_v34 = vadd.f32 %v1009_v60, %v993_v40 }
 0x1f4   : >> { %v1011_v54 = vrot.slane %v1010_v34, 4 }
 0x1f6   : >> { %v1012_v24 = vadd.f32 %v1011_v54, %v1010_v34  ;;  %v3334_v54 = vld [vmem:[#allocation20_spill] sm:$0xff] }
 0x1f8   : >> { %v1013_v30 = vrot.slane %v1012_v24, 2 }
 0x1fa   : >> { %v1014_v63 = vadd.f32 %v1013_v30, %v1012_v24 }
 0x1fc   : >> { %v1015_v37 = vrot.slane %v1014_v63, 1 }
 0x1fe   : >> { %v1016_v13 = vadd.f32 %v1015_v37, %v1014_v63  ;;  %v3335_v63 = vld [vmem:[#allocation21_spill] sm:$0xff] }
 0x200   : >> { %v1857_v28 = vadd.f32 -1.0, %v1016_v13 }
 0x202   : >> { %v1018_v56 = vsel %vm299_vm2, %v1857_v28, 0.0  ;;  %v1019_v38 = vsel %vm300_vm3, %v1857_v28, 0.0  ;;  %v1020_v10 = vsel %vm301_vm4, %v1857_v28, 0.0  ;;  %v1021_v61 = vsel %vm302_vm5, %v1857_v28, 0.0 }
 0x203   : >> { %v1026_v53 = vsub.f32 %v1018_v56, %v986_v48  ;;  %v1027_v62 = vsub.f32 %v1019_v38, %v987_v36  ;;  %v1028_v5 = vsub.f32 %v1020_v10, %v988_v46  ;;  %v1029_v43 = vsub.f32 %v1021_v61, %v989_v55  ;;  %v3330_v36 = vld [vmem:[#allocation14_spill] sm:$0xff] }
 0x204   : >> { %v1022_v50 = vsel %vm303_vm6, %v1857_v28, 0.0  ;;  %v1023_v39 = vsel %vm304_vm7, %v1857_v28, 0.0  ;;  %v1024_v22 = vsel %vm305_vm8, %v1857_v28, 0.0  ;;  %v1025_v49 = vsel %vm306_vm9, %v1857_v28, 0.0 }
 0x205   : >> { %2000 = vmatprep.mubr.f32.mxu0 %v1026_v53  ;;  %v1414_v0 = vmul.f32 2.0, %v1027_v62  ;;  %v1030_v35 = vsub.f32 %v1022_v50, %v990_v25  ;;  %v1413_v15 = vmul.f32 2.0, %v1026_v53  ;;  %v1415_v19 = vmul.f32 2.0, %v1028_v5 }
 0x206   : >> { %2001 = vmatmul.mubr.f32.vlgmr.msra.gmra.mrb[0].mxu0 %v1027_v62  ;;  %v1031_v18 = vsub.f32 %v1023_v39, %v991_v11  ;;  %v1032_v21 = vsub.f32 %v1024_v22, %v992_v6  ;;  %v1416_v51 = vmul.f32 2.0, %v1029_v43  ;;  %v1033_v16 = vsub.f32 %v1025_v49, %v993_v40  ;;  %v3331_v11 = vld [vmem:[#allocation16_spill] sm:$0xff] }
 0x207   : >> { %v1422_v45 = vmul.f32 %v1414_v0, %v1027_v62  ;;  %2003 = vmatprep.mubr.f32.mxu0 %v1028_v5  ;;  %v1421_v33 = vmul.f32 %v1413_v15, %v1026_v53  ;;  %v1423_v42 = vmul.f32 %v1415_v19, %v1028_v5  ;;  %v1417_v12 = vmul.f32 2.0, %v1030_v35  ;;  %2141 = vmatpush3.bf16.msk.msra.mxu0 %vm2995_vm14, %v3097_v57  ;;  %v3332_v57 = vld [vmem:[#allocation18_spill] sm:$0xff] }
 0x208   : >> { %v1424_v55 = vmul.f32 %v1416_v51, %v1029_v43  ;;  %v1418_v25 = vmul.f32 2.0, %v1031_v18  ;;  %v1419_v23 = vmul.f32 2.0, %v1032_v21  ;;  %v1420_v27 = vmul.f32 2.0, %v1033_v16 }
 0x209   : >> { %v1430_v48 = vsub.f32 %v1422_v45, %v3329_v52  ;;  %v1429_v46 = vsub.f32 %v1421_v33, %v3330_v36  ;;  %v1431_v6 = vsub.f32 %v1423_v42, %v3331_v11  ;;  %v1425_v40 = vmul.f32 %v1417_v12, %v1030_v35 }
 0x20a   : >> { %2004 = vmatmul.mubr.f32.gmra.mrb[2].mxu0 %v1029_v43  ;;  %v1432_v59 = vsub.f32 %v1424_v55, %v3332_v57  ;;  %v1426_v20 = vmul.f32 %v1418_v25, %v1031_v18  ;;  %v1427_v34 = vmul.f32 %v1419_v23, %v1032_v21  ;;  %v1428_v30 = vmul.f32 %v1420_v27, %v1033_v16 }
 0x20b   : >> { %2006 = vmatprep.mubr.f32.mxu0 %v1030_v35  ;;  %2076 = vmatprep.mubr.f32.mxu1 %v1429_v46  ;;  %v1433_v60 = vsub.f32 %v1425_v40, %v3333_v31 }
 0x20c   : >> { %2077 = vmatmul.mubr.f32.vlgmr.msra.gmra.mrb[8].mxu1 %v1430_v48  ;;  %v1434_v24 = vsub.f32 %v1426_v20, %v3334_v54  ;;  %v1435_v37 = vsub.f32 %v1427_v34, %v3335_v63 }
 0x20d   : >> { %2079 = vmatprep.mubr.f32.mxu1 %v1431_v6  ;;  %2185 = vmatpush3.bf16.msk.msra.mxu1 %vm2995_vm14, %v3101_v58  ;;  %v1436_v58 = vsub.f32 %v1428_v30, %v3336_v44 }
 0x20e   : >> { %2007 = vmatmul.mubr.f32.gmra.mrb[4].mxu0 %v1031_v18 }
 0x20f   : >> { %2009 = vmatprep.mubr.f32.mxu0 %v1032_v21 }
 0x210   : >> { %2080 = vmatmul.mubr.f32.gmra.mrb[10].mxu1 %v1432_v59 }
 0x211   : >> { %2082 = vmatprep.mubr.f32.mxu1 %v1433_v60 }
 0x212   : >> { %2010 = vmatmul.mubr.f32.gmra.mrb[6].mxu0 %v1033_v16 }
 0x214   : >> { %2083 = vmatmul.mubr.f32.gmra.mrb[12].mxu1 %v1434_v24 }
 0x215   : >> { %2085 = vmatprep.mubr.f32.mxu1 %v1435_v37 }
 0x218   : >> { %2086 = vmatmul.mubr.f32.gmra.mrb[14].mxu1 %v1436_v58 }
 0x2d9   : >> { %v2002_v13 = vpop.f32.mrb[0].mxu0 }
 0x2da   : >> { %v1108_v28 = vpop.f32.mrb[1].mxu0 }
 0x2db   : >> { %2016 = vmatprep.mubr.msk.f32.mxu0 %vm1147_vm15, %v1108_v28 }
 0x2dc   : >> { %2017 = vmatmul.mubr.msk.f32.vlgmr.msra.gmra.mrb[8].mxu0 %vm1147_vm15, %v2002_v13 }
 0x2dd   : >> { %v2005_v56 = vpop.f32.mrb[2].mxu0 }
 0x2de   : >> { %v1118_v26 = vpop.f32.mrb[3].mxu0 }
 0x2df   : >> { %2019 = vmatprep.mubr.msk.f32.mxu0 %vm1147_vm15, %v1118_v26  ;;  %v2078_v38 = vpop.f32.mrb[8].mxu1 }
 0x2e0   : >> { %2020 = vmatmul.mubr.msk.f32.gmra.mrb[10].mxu0 %vm1147_vm15, %v2005_v56  ;;  %v1503_v32 = vpop.f32.mrb[9].mxu1 }
 0x2e1   : >> { %v2008_v10 = vpop.f32.mrb[4].mxu0  ;;  %2092 = vmatprep.mubr.msk.f32.mxu1 %vm1147_vm15, %v1503_v32 }
 0x2e2   : >> { %v1128_v41 = vpop.f32.mrb[5].mxu0  ;;  %2093 = vmatmul.mubr.msk.f32.vlgmr.msra.gmra.mrb[0].mxu1 %vm1147_vm15, %v2078_v38 }
 0x2e3   : >> { %2022 = vmatprep.mubr.msk.f32.mxu0 %vm1147_vm15, %v1128_v41  ;;  %v2081_v61 = vpop.f32.mrb[10].mxu1 }
 0x2e4   : >> { %2023 = vmatmul.mubr.msk.f32.gmra.mrb[12].mxu0 %vm1147_vm15, %v2008_v10  ;;  %v1513_v53 = vpop.f32.mrb[11].mxu1 }
 0x2e5   : >> { %v2011_v62 = vpop.f32.mrb[6].mxu0  ;;  %2095 = vmatprep.mubr.msk.f32.mxu1 %vm1147_vm15, %v1513_v53 }
 0x2e6   : >> { %v1138_v5 = vpop.f32.mrb[7].mxu0  ;;  %2096 = vmatmul.mubr.msk.f32.gmra.mrb[2].mxu1 %vm1147_vm15, %v2081_v61 }
 0x2e7   : >> { %2025 = vmatprep.mubr.msk.f32.mxu0 %vm1147_vm15, %v1138_v5  ;;  %v2084_v43 = vpop.f32.mrb[12].mxu1 }
 0x2e8   : >> { %2026 = vmatmul.mubr.msk.f32.gmra.mrb[14].mxu0 %vm1147_vm15, %v2011_v62  ;;  %v1523_v14 = vpop.f32.mrb[13].mxu1 }
 0x2e9   : >> { %2098 = vmatprep.mubr.msk.f32.mxu1 %vm1147_vm15, %v1523_v14 }
 0x2ea   : >> { %2099 = vmatmul.mubr.msk.f32.gmra.mrb[4].mxu1 %vm1147_vm15, %v2084_v43 }
 0x2eb   : >> { %v2087_v50 = vpop.f32.mrb[14].mxu1 }
 0x2ec   : >> { %v1533_v47 = vpop.f32.mrb[15].mxu1 }
 0x2ed   : >> { %2101 = vmatprep.mubr.msk.f32.mxu1 %vm1147_vm15, %v1533_v47 }
 0x2ee   : >> { %2102 = vmatmul.mubr.msk.f32.gmra.mrb[6].mxu1 %vm1147_vm15, %v2087_v50 }
 0x3af   : >> { %v2018_v39 = vpop.f32.mrb[8].mxu0 }
 0x3b0   : >> { %v1242_v29 = vpop.f32.mrb[9].mxu0 }
 0x3b3   : >> { %v2021_v22 = vpop.f32.mrb[10].mxu0 }
 0x3b4   : >> { %v1252_v9 = vpop.f32.mrb[11].mxu0 }
 0x3b5   : >> { %v2094_v49 = vpop.f32.mrb[0].mxu1 }
 0x3b6   : >> { %v2186_v0 = vadd.f32 %v2094_v49, %v2018_v39  ;;  %v1635_v35 = vpop.f32.mrb[1].mxu1 }
 0x3b7   : >> { %v2187_v15 = vadd.f32 %v1635_v35, %v1242_v29  ;;  %v2024_v19 = vpop.f32.mrb[12].mxu0 }
 0x3b8   : >> { %v1683_v18 = vmax.f32 %v2186_v0, 0.0  ;;  %v1262_v21 = vpop.f32.mrb[13].mxu0 }
 0x3b9   : >> { %v1682_v51 = vmax.f32 %v2187_v15, 0.0  ;;  %v2097_v16 = vpop.f32.mrb[2].mxu1 }
 0x3ba   : >> { %1693 = vst.msk [vmem:[%s3231_s22 + $0x8] sm:$0xff] %vm1691_vm1, %v1683_v18  ;;  %v2188_v45 = vadd.f32 %v2097_v16, %v2021_v22  ;;  %v1645_v33 = vpop.f32.mrb[3].mxu1 }
 0x3bb   : >> { %1692 = vst.msk [vmem:[%s3231_s22] sm:$0xff] %vm1691_vm1, %v1682_v51  ;;  %v2189_v42 = vadd.f32 %v1645_v33, %v1252_v9  ;;  %v2027_v12 = vpop.f32.mrb[14].mxu0 }
 0x3bc   : >> { %v1685_v52 = vmax.f32 %v2188_v45, 0.0  ;;  %v1272_v48 = vpop.f32.mrb[15].mxu0 }
 0x3bd   : >> { %v1684_v36 = vmax.f32 %v2189_v42, 0.0  ;;  %v2100_v46 = vpop.f32.mrb[4].mxu1 }
 0x3be   : >> { %1695 = vst.msk [vmem:[%s3231_s22 + $0x18] sm:$0xff] %vm1691_vm1, %v1685_v52  ;;  %v2190_v55 = vadd.f32 %v2100_v46, %v2024_v19  ;;  %v1655_v25 = vpop.f32.mrb[5].mxu1 }
 0x3bf   : >> { %1694 = vst.msk [vmem:[%s3231_s22 + $0x10] sm:$0xff] %vm1691_vm1, %v1684_v36  ;;  %v2191_v11 = vadd.f32 %v1655_v25, %v1262_v21 }
 0x3c0   : >> { %v1687_v6 = vmax.f32 %v2190_v55, 0.0 }
 0x3c1   : >> { %v1686_v40 = vmax.f32 %v2191_v11, 0.0  ;;  %v2103_v23 = vpop.f32.mrb[6].mxu1  ;;  %347 = sbr.rel (!%p345_p1) target bundleno = 46 (0x2e), region = 97 }
 0x3c2   : >> { %1697 = vst.msk [vmem:[%s3231_s22 + $0x28] sm:$0xff] %vm1691_vm1, %v1687_v6  ;;  %v2192_v57 = vadd.f32 %v2103_v23, %v2027_v12  ;;  %v1665_v59 = vpop.f32.mrb[7].mxu1 }
 0x3c3   : >> { %1696 = vst.msk [vmem:[%s3231_s22 + $0x20] sm:$0xff] %vm1691_vm1, %v1686_v40  ;;  %v2193_v20 = vadd.f32 %v1665_v59, %v1272_v48 }
 0x3c4   : >> { %v1689_v27 = vmax.f32 %v2192_v57, 0.0 }
 0x3c5   : >> { %v1688_v31 = vmax.f32 %v2193_v20, 0.0 }
 0x3c6   : >> { %1699 = vst.msk [vmem:[%s3231_s22 + $0x38] sm:$0xff] %vm1691_vm1, %v1689_v27 }
 0x3c7   : >> { %1698 = vst.msk [vmem:[%s3231_s22 + $0x30] sm:$0xff] %vm1691_vm1, %v1688_v31 }
 0x3c8 PF: > { %s17_s18 = sadd.s32 1, %s2348_s18  }
 0x3c9   : > { %p14_p2 = scmp.ge.s32.totalorder %s17_s18, 4  }
 0x3cb   :  { %16 = sbr.rel (!%p14_p2) target bundleno = 1 (0x1), region = 108 }
 0x3d2   :  { %1743 = vsyncpa [#allocation3], 1 }
 0x3d3   :  { %1745 = vsyncpa [#allocation3 + $0x1], 1 }

</bundles_post_ra>
